<compile_context>
chip_gen: v5e
topology: v5e:2x2
jax: 0.10.0
libtpu: 0.0.40
codegen_flags: <defaults>
</compile_context>

<pallas_src>
import functools

import jax
import jax.numpy as jnp
from jax.experimental import pallas as pl
from jax.experimental.pallas import tpu as pltpu

EPS = 1e-5                       # nn.BatchNorm1d default eps
_VMEM_LIMIT = 56 * 1024 * 1024   # > default scoped VMEM (v5e/v6e), < v7x phys


def _channel_tile(c):
    """Lane-friendly output-channel tile: 128 when divisible, else full dim."""
    return 128 if c % 128 == 0 else c


def _shift_rows_circular(t):
    """t[:, j, :] <- t[:, j-1, :], with row 0 <- last row (circular, axis 1)."""
    if t.shape[1] % 8 == 0 and t.shape[2] % 128 == 0:
        # Aligned tiles: XLU sublane rotation, no VALU/store-path copy.
        return pltpu.roll(t, shift=1, axis=1)
    # Small / lane-padded tiles: safe slice + concat fallback.
    return jnp.concatenate([t[:, -1:, :], t[:, :-1, :]], axis=1)


# ---------------------------------------------------------------------------
# Pallas kernels
# ---------------------------------------------------------------------------
def _down_conv_bn_relu_kernel(u_ref, w12_ref, w0_ref, g_ref, beta_ref, o_ref):
    """Circular stride-2 Conv1d + BatchNorm(batch stats) + ReLU, one Cout tile.

    u_ref  : (B, Lout, 2*Cin)      folded input rows:
             u[b, m, :Cin] = x[b, 2m, :],  u[b, m, Cin:] = x[b, 2m+1, :]
    w12_ref: (2*Cin, tn) bf16      [W_k1 ; W_k2]
    w0_ref : (Cin, tn)   bf16      W_k0
    g_ref, beta_ref : (1, tn) f32  BatchNorm gamma / beta
    o_ref  : (B, Lout, tn) bf16
    """
    cin = w0_ref.shape[0]
    u = u_ref[...].astype(jnp.bfloat16)
    # taps k=1 (even row) and k=2 (odd row) of output position j.
    y = jnp.einsum("blk,kn->bln", u, w12_ref[...],
                   preferred_element_type=jnp.float32)
    # tap k=0 at output j is (odd input row of output j-1) @ W0, circular in j;
    # contract only the odd half (K = Cin) -- no zero-padded weight.
    t0 = jnp.einsum("blk,kn->bln", u[:, :, cin:], w0_ref[...],
                    preferred_element_type=jnp.float32)
    y = y + _shift_rows_circular(t0)

    # BatchNorm1d forward (training mode -> biased batch stats), single pass.
    n = jnp.float32(y.shape[0] * y.shape[1])
    s = jnp.sum(jnp.sum(y, axis=1, keepdims=True), axis=0, keepdims=True)
    ss = jnp.sum(jnp.sum(y * y, axis=1, keepdims=True), axis=0, keepdims=True)
    mean = s / n
    var = jnp.maximum(ss / n - mean * mean, 0.0)
    scale = g_ref[...] * jax.lax.rsqrt(var + EPS)           # (1, 1, tn)
    shift = beta_ref[...] - mean * scale
    o_ref[...] = jnp.maximum(y * scale + shift, 0.0).astype(o_ref.dtype)


def _up_conv_bn_relu_kernel(x_ref, w_ref, g_ref, beta_ref, oe_ref, oo_ref):
    """Stride-2 ConvTranspose1d (pad=1) + BatchNorm(batch stats) + ReLU,
    decomposed into even / odd output positions; the three taps are fused
    along N into one (Cin, 3*tn) MXU matmul.

    x_ref : (B, Lin, Cin) bf16
    w_ref : (Cin, 3*tn)   bf16  columns = [W_k0 | W_k1 | W_k2] for this tile
    oe_ref: (B, Lin, tn)  bf16  out[2m]   = x[m] @ W1
    oo_ref: (B, Lin, tn)  bf16  out[2m+1] = x[m+1] @ W0 + x[m] @ W2
                                (last row is padding, zeroed before BN)
    """
    tn = oe_ref.shape[-1]
    x = x_ref[...].astype(jnp.bfloat16)
    yy = jnp.einsum("blc,cn->bln", x, w_ref[...],
                    preferred_element_type=jnp.float32)     # (B, Lin, 3*tn)
    a0, y_e, a2 = yy[:, :, :tn], yy[:, :, tn:2 * tn], yy[:, :, 2 * tn:]
    b, lin = y_e.shape[0], y_e.shape[1]
    y_o = jnp.concatenate(
        [a0[:, 1:, :] + a2[:, :-1, :],
         jnp.zeros((b, 1, tn), jnp.float32)], axis=1)        # (B, Lin, tn)

    # BatchNorm stats over the interleaved length 2*Lin - 1 (the padded odd
    # row is zero and excluded from the element count).
    n = jnp.float32(b * (2 * lin - 1))
    s = (jnp.sum(jnp.sum(y_e, axis=1, keepdims=True), axis=0, keepdims=True) +
         jnp.sum(jnp.sum(y_o, axis=1, keepdims=True), axis=0, keepdims=True))
    ss = (jnp.sum(jnp.sum(y_e * y_e, axis=1, keepdims=True), axis=0,
                  keepdims=True) +
          jnp.sum(jnp.sum(y_o * y_o, axis=1, keepdims=True), axis=0,
                  keepdims=True))
    mean = s / n
    var = jnp.maximum(ss / n - mean * mean, 0.0)
    scale = g_ref[...] * jax.lax.rsqrt(var + EPS)
    shift = beta_ref[...] - mean * scale
    oe_ref[...] = jnp.maximum(y_e * scale + shift, 0.0).astype(oe_ref.dtype)
    oo_ref[...] = jnp.maximum(y_o * scale + shift, 0.0).astype(oo_ref.dtype)


def _interp_matmul_kernel(a_ref, x_ref, o_ref):
    """out[b] = A @ x[b]; A is the exact (T, Lsrc) linear-interp matrix."""
    x = x_ref[0].astype(jnp.float32)                         # (Lsrc, tc)
    o_ref[0] = jnp.dot(a_ref[...], x, preferred_element_type=jnp.float32)


# ---------------------------------------------------------------------------
# pallas_call wrappers
# ---------------------------------------------------------------------------
def down_conv_bn_relu(x, w, gamma, beta):
    """x: (B, L, Cin), L even.  w: PyTorch Conv1d weight (Cout, Cin, 3)."""
    B, L, Cin = x.shape
    Cout = w.shape[0]
    assert L % 2 == 0, "down-sampling layer requires an even input length"
    Lout = L // 2
    tn = _channel_tile(Cout)

    u = x.reshape(B, Lout, 2 * Cin)                  # free fold (no im2col)
    wk = jnp.transpose(w, (2, 1, 0))                 # (3, Cin, Cout)
    w12 = jnp.concatenate([wk[1], wk[2]], axis=0).astype(jnp.bfloat16)
    w0 = wk[0].astype(jnp.bfloat16)
    g2 = gamma.reshape(1, Cout).astype(jnp.float32)
    b2 = beta.reshape(1, Cout).astype(jnp.float32)

    return pl.pallas_call(
        _down_conv_bn_relu_kernel,
        out_shape=jax.ShapeDtypeStruct((B, Lout, Cout), jnp.bfloat16),
        grid=(Cout // tn,),
        in_specs=[
            pl.BlockSpec((B, Lout, 2 * Cin), lambda j: (0, 0, 0)),
            pl.BlockSpec((2 * Cin, tn), lambda j: (0, j)),
            pl.BlockSpec((Cin, tn), lambda j: (0, j)),
            pl.BlockSpec((1, tn), lambda j: (0, j)),
            pl.BlockSpec((1, tn), lambda j: (0, j)),
        ],
        out_specs=pl.BlockSpec((B, Lout, tn), lambda j: (0, 0, j)),
        compiler_params=pltpu.CompilerParams(
            dimension_semantics=("parallel",),
            vmem_limit_bytes=_VMEM_LIMIT),
    )(u, w12, w0, g2, b2)


def up_conv_bn_relu(x, w, gamma, beta):
    """x: (B, Lin, Cin).  w: PyTorch ConvTranspose1d weight (Cin, Cout, 3).
    Returns the interleaved (B, 2*Lin - 1, Cout) activation (bf16)."""
    B, Lin, Cin = x.shape
    Cout = w.shape[1]
    tn = _channel_tile(Cout)
    n_tiles = Cout // tn

    xb = x.astype(jnp.bfloat16)
    wk = jnp.transpose(w, (2, 0, 1))                 # (3, Cin, Cout)
    # Per-Cout-tile layout [W0_j | W1_j | W2_j] so one BlockSpec column block
    # holds all three taps of tile j.
    wt = (wk.reshape(3, Cin, n_tiles, tn)
            .transpose(1, 2, 0, 3)
            .reshape(Cin, n_tiles * 3 * tn)
            .astype(jnp.bfloat16))
    g2 = gamma.reshape(1, Cout).astype(jnp.float32)
    b2 = beta.reshape(1, Cout).astype(jnp.float32)

    even, odd = pl.pallas_call(
        _up_conv_bn_relu_kernel,
        out_shape=(jax.ShapeDtypeStruct((B, Lin, Cout), jnp.bfloat16),
                   jax.ShapeDtypeStruct((B, Lin, Cout), jnp.bfloat16)),
        grid=(n_tiles,),
        in_specs=[
            pl.BlockSpec((B, Lin, Cin), lambda j: (0, 0, 0)),
            pl.BlockSpec((Cin, 3 * tn), lambda j: (0, j)),
            pl.BlockSpec((1, tn), lambda j: (0, j)),
            pl.BlockSpec((1, tn), lambda j: (0, j)),
        ],
        out_specs=(pl.BlockSpec((B, Lin, tn), lambda j: (0, 0, j)),
                   pl.BlockSpec((B, Lin, tn), lambda j: (0, 0, j))),
        compiler_params=pltpu.CompilerParams(
            dimension_semantics=("parallel",),
            vmem_limit_bytes=_VMEM_LIMIT),
    )(xb, wt, g2, b2)

    # Interleave even / odd positions and drop the single padded row; one
    # fused XLA pass over the activation.
    out = jnp.stack([even, odd], axis=2).reshape(B, 2 * Lin, Cout)
    return out[:, :2 * Lin - 1, :]


def linear_interpolate(x, target_len):
    """F.interpolate(mode='linear', align_corners=False) along L of (B, L, C),
    as an exact interpolation-matrix matmul (x is read exactly once)."""
    B, Lin, C = x.shape
    tc = _channel_tile(C)

    scale = Lin / target_len
    j = jnp.arange(target_len, dtype=jnp.float32)
    src = jnp.maximum((j + 0.5) * scale - 0.5, 0.0)
    i0 = jnp.clip(jnp.floor(src).astype(jnp.int32), 0, Lin - 1)
    i1 = jnp.minimum(i0 + 1, Lin - 1)
    lam = src - i0.astype(jnp.float32)
    a = (jax.nn.one_hot(i0, Lin, dtype=jnp.float32) * (1.0 - lam)[:, None] +
         jax.nn.one_hot(i1, Lin, dtype=jnp.float32) * lam[:, None])

    return pl.pallas_call(
        _interp_matmul_kernel,
        out_shape=jax.ShapeDtypeStruct((B, target_len, C), jnp.float32),
        grid=(B, C // tc),
        in_specs=[
            pl.BlockSpec((target_len, Lin), lambda b, g: (0, 0)),
            pl.BlockSpec((1, Lin, tc), lambda b, g: (b, 0, g)),
        ],
        out_specs=pl.BlockSpec((1, target_len, tc), lambda b, g: (b, 0, g)),
        compiler_params=pltpu.CompilerParams(
            dimension_semantics=("parallel", "parallel"),
            vmem_limit_bytes=_VMEM_LIMIT),
    )(a, x)


# ---------------------------------------------------------------------------
# Model: parameters + forward
# ---------------------------------------------------------------------------
def make_params(key, d_model, e_layers):
    d_model_f = d_model * 2 ** e_layers
    params = {"down": [], "up": []}
    for i in range(e_layers):
        in_c, out_c = d_model * 2 ** i, d_model * 2 ** (i + 1)
        key, k1, k2 = jax.random.split(key, 3)
        params["down"].append({
            "w": jax.random.normal(k1, (out_c, in_c, 3), jnp.float32) * 0.1,
            # conv bias exists in the module but is exactly cancelled by
            # train-mode BatchNorm (mean subtraction) -> not used in forward.
            "b": jax.random.normal(k2, (out_c,), jnp.float32) * 0.1,
            "gamma": jnp.ones((out_c,), jnp.float32),
            "beta": jnp.zeros((out_c,), jnp.float32),
        })
    for i in range(e_layers):
        in_c, out_c = d_model_f // 2 ** i, d_model_f // 2 ** (i + 1)
        key, k1, k2 = jax.random.split(key, 3)
        params["up"].append({
            "w": jax.random.normal(k1, (in_c, out_c, 3), jnp.float32) * 0.1,
            "b": jax.random.normal(k2, (out_c,), jnp.float32) * 0.1,
            "gamma": jnp.ones((out_c,), jnp.float32),
            "beta": jnp.zeros((out_c,), jnp.float32),
        })
    return params


def fcn_n_forward(params, x, *, seq_len, e_layers):
    # x: (B, seq_len, d_model), channels-last, like the PyTorch forward input.
    for i in range(e_layers):
        p = params["down"][i]
        x = down_conv_bn_relu(x, p["w"], p["gamma"], p["beta"])
    for i in range(e_layers):
        p = params["up"][i]
        x = up_conv_bn_relu(x, p["w"], p["gamma"], p["beta"])
    # padding_type == 'interpolate' branch of the PyTorch forward.
    return linear_interpolate(x, seq_len)


if __name__ == "__main__":
    B, seq_len, d_model, e_layers = 2, 16, 4, 2
    key = jax.random.PRNGKey(0)
    key, xk, pk = jax.random.split(key, 3)
    x = jax.random.normal(xk, (B, seq_len, d_model), jnp.float32)
    params = make_params(pk, d_model, e_layers)

    fwd = jax.jit(functools.partial(fcn_n_forward, seq_len=seq_len,
                                    e_layers=e_layers))
    out = jax.block_until_ready(fwd(params, x))
    assert out.shape == (B, seq_len, d_model), out.shape
    assert jnp.all(jnp.isfinite(out))
    print("KERNEL_OK")
</pallas_src>

<mosaic_0001>
module attributes {stable_mosaic.version = 11 : i64} {
  func.func @_down_conv_bn_relu_kernel(%arg0: i32, %arg1: memref<2x8x8xf32, #tpu.memory_space<vmem>>, %arg2: memref<8x8xbf16, #tpu.memory_space<vmem>>, %arg3: memref<4x8xbf16, #tpu.memory_space<vmem>>, %arg4: memref<1x8xf32, #tpu.memory_space<vmem>>, %arg5: memref<1x8xf32, #tpu.memory_space<vmem>>, %arg6: memref<2x8x8xbf16, #tpu.memory_space<vmem>>) attributes {dimension_semantics = [#tpu.dimension_semantics<parallel>], iteration_bounds = array<i64: 1>, scalar_prefetch = 0 : i64, scratch_operands = 0 : i64, tpu.core_type = #tpu.core_type<tc>, window_params = [{pipeline_mode = #tpu.pipeline_mode<synchronous>, transform_indices = @transform_0, window_bounds = array<i64: 2, 8, 8>}, {transform_indices = @transform_1, window_bounds = array<i64: 8, 8>}, {transform_indices = @transform_2, window_bounds = array<i64: 4, 8>}, {transform_indices = @transform_3, window_bounds = array<i64: 1, 8>}, {transform_indices = @transform_4, window_bounds = array<i64: 1, 8>}, {transform_indices = @transform_5, window_bounds = array<i64: 2, 8, 8>}]} {
    %c0 = arith.constant 0 : index
    %c0_0 = arith.constant 0 : index
    %c0_1 = arith.constant 0 : index
    %0 = vector.load %arg1[%c0, %c0_0, %c0_1] : memref<2x8x8xf32, #tpu.memory_space<vmem>>, vector<2x8x8xf32>
    %1 = arith.truncf %0 : vector<2x8x8xf32> to vector<2x8x8xbf16>
    %c0_2 = arith.constant 0 : index
    %c0_3 = arith.constant 0 : index
    %2 = vector.load %arg2[%c0_2, %c0_3] : memref<8x8xbf16, #tpu.memory_space<vmem>>, vector<8x8xbf16>
    "tpu.trace_start"() <{level = 10 : i32, message = "blk,kn->bln"}> : () -> ()
    %cst = arith.constant dense<0.000000e+00> : vector<2x8x8xf32>
    %3 = tpu.matmul %1, %2, %cst {dimension_numbers = #tpu.dot_dimension_numbers<[2], [0], [0, 1], [1], [0, 0, 0, 1, 1, 1], [], []>} : vector<2x8x8xbf16>, vector<8x8xbf16>, vector<2x8x8xf32> -> vector<2x8x8xf32>
    "tpu.trace_stop"() : () -> ()
    %4 = vector.extract_strided_slice %1 {offsets = [0, 0, 4], sizes = [2, 8, 4], strides = [1, 1, 1]} : vector<2x8x8xbf16> to vector<2x8x4xbf16>
    %c0_4 = arith.constant 0 : index
    %c0_5 = arith.constant 0 : index
    %5 = vector.load %arg3[%c0_4, %c0_5] : memref<4x8xbf16, #tpu.memory_space<vmem>>, vector<4x8xbf16>
    "tpu.trace_start"() <{level = 10 : i32, message = "blk,kn->bln"}> : () -> ()
    %cst_6 = arith.constant dense<0.000000e+00> : vector<2x8x8xf32>
    %6 = tpu.matmul %4, %5, %cst_6 {dimension_numbers = #tpu.dot_dimension_numbers<[2], [0], [0, 1], [1], [0, 0, 0, 1, 1, 1], [], []>} : vector<2x8x4xbf16>, vector<4x8xbf16>, vector<2x8x8xf32> -> vector<2x8x8xf32>
    "tpu.trace_stop"() : () -> ()
    %7 = vector.extract_strided_slice %6 {offsets = [0, 7, 0], sizes = [2, 1, 8], strides = [1, 1, 1]} : vector<2x8x8xf32> to vector<2x1x8xf32>
    %8 = vector.extract_strided_slice %6 {offsets = [0, 0, 0], sizes = [2, 7, 8], strides = [1, 1, 1]} : vector<2x8x8xf32> to vector<2x7x8xf32>
    %9 = tpu.concatenate %7, %8 in 1 : vector<2x1x8xf32>, vector<2x7x8xf32> -> vector<2x8x8xf32>
    %10 = arith.addf %3, %9 : vector<2x8x8xf32>
    %cst_7 = arith.constant dense<0.000000e+00> : vector<2x8xf32>
    %11 = vector.multi_reduction <add>, %10, %cst_7 [1] : vector<2x8x8xf32> to vector<2x8xf32>
    %12 = vector.shape_cast %11 : vector<2x8xf32> to vector<2x1x8xf32>
    %cst_8 = arith.constant dense<0.000000e+00> : vector<1x8xf32>
    %13 = vector.multi_reduction <add>, %12, %cst_8 [0] : vector<2x1x8xf32> to vector<1x8xf32>
    %14 = vector.shape_cast %13 : vector<1x8xf32> to vector<1x1x8xf32>
    %15 = arith.mulf %10, %10 : vector<2x8x8xf32>
    %cst_9 = arith.constant dense<0.000000e+00> : vector<2x8xf32>
    %16 = vector.multi_reduction <add>, %15, %cst_9 [1] : vector<2x8x8xf32> to vector<2x8xf32>
    %17 = vector.shape_cast %16 : vector<2x8xf32> to vector<2x1x8xf32>
    %cst_10 = arith.constant dense<0.000000e+00> : vector<1x8xf32>
    %18 = vector.multi_reduction <add>, %17, %cst_10 [0] : vector<2x1x8xf32> to vector<1x8xf32>
    %19 = vector.shape_cast %18 : vector<1x8xf32> to vector<1x1x8xf32>
    %cst_11 = arith.constant 1.600000e+01 : f32
    %20 = vector.broadcast %cst_11 : f32 to vector<1x1x8xf32>
    %21 = arith.divf %14, %20 : vector<1x1x8xf32>
    %cst_12 = arith.constant 1.600000e+01 : f32
    %22 = vector.broadcast %cst_12 : f32 to vector<1x1x8xf32>
    %23 = arith.divf %19, %22 : vector<1x1x8xf32>
    %24 = arith.mulf %21, %21 : vector<1x1x8xf32>
    %25 = arith.subf %23, %24 : vector<1x1x8xf32>
    %cst_13 = arith.constant 0.000000e+00 : f32
    %26 = vector.broadcast %cst_13 : f32 to vector<1x1x8xf32>
    %27 = arith.maximumf %25, %26 : vector<1x1x8xf32>
    %c0_14 = arith.constant 0 : index
    %c0_15 = arith.constant 0 : index
    %28 = vector.load %arg4[%c0_14, %c0_15] : memref<1x8xf32, #tpu.memory_space<vmem>>, vector<1x8xf32>
    %cst_16 = arith.constant 9.99999974E-6 : f32
    %29 = vector.broadcast %cst_16 : f32 to vector<1x1x8xf32>
    %30 = arith.addf %27, %29 : vector<1x1x8xf32>
    %31 = math.rsqrt %30 : vector<1x1x8xf32>
    %32 = vector.shape_cast %28 : vector<1x8xf32> to vector<1x1x8xf32>
    %33 = arith.mulf %32, %31 : vector<1x1x8xf32>
    %c0_17 = arith.constant 0 : index
    %c0_18 = arith.constant 0 : index
    %34 = vector.load %arg5[%c0_17, %c0_18] : memref<1x8xf32, #tpu.memory_space<vmem>>, vector<1x8xf32>
    %35 = arith.mulf %21, %33 : vector<1x1x8xf32>
    %36 = vector.shape_cast %34 : vector<1x8xf32> to vector<1x1x8xf32>
    %37 = arith.subf %36, %35 : vector<1x1x8xf32>
    %38 = vector.broadcast %33 : vector<1x1x8xf32> to vector<2x8x8xf32>
    %39 = arith.mulf %10, %38 : vector<2x8x8xf32>
    %40 = vector.broadcast %37 : vector<1x1x8xf32> to vector<2x8x8xf32>
    %41 = arith.addf %39, %40 : vector<2x8x8xf32>
    %cst_19 = arith.constant 0.000000e+00 : f32
    %42 = vector.broadcast %cst_19 : f32 to vector<2x8x8xf32>
    %43 = arith.maximumf %41, %42 : vector<2x8x8xf32>
    %44 = arith.truncf %43 : vector<2x8x8xf32> to vector<2x8x8xbf16>
    %c0_20 = arith.constant 0 : index
    %c0_21 = arith.constant 0 : index
    %c0_22 = arith.constant 0 : index
    %45 = vector.load %arg6[%c0_20, %c0_21, %c0_22] : memref<2x8x8xbf16, #tpu.memory_space<vmem>>, vector<2x8x8xbf16>
    tpu.vector_store %arg6[%c0_20, %c0_21, %c0_22], %44 {strides = array<i32>} : memref<2x8x8xbf16, #tpu.memory_space<vmem>>, vector<2x8x8xbf16>,
    return
  }
  func.func @transform_0(%arg0: i32) -> (i32, i32, i32) {
    %c0_i32 = arith.constant 0 : i32
    %c0_i32_0 = arith.constant 0 : i32
    %c0_i32_1 = arith.constant 0 : i32
    %c0_i32_2 = arith.constant 0 : i32
    return %c0_i32, %c0_i32_0, %c0_i32_1 : i32, i32, i32
  }
  func.func @transform_1(%arg0: i32) -> (i32, i32) {
    %c0_i32 = arith.constant 0 : i32
    %c0_i32_0 = arith.constant 0 : i32
    return %c0_i32, %arg0 : i32, i32
  }
  func.func @transform_2(%arg0: i32) -> (i32, i32) {
    %c0_i32 = arith.constant 0 : i32
    %c0_i32_0 = arith.constant 0 : i32
    return %c0_i32, %arg0 : i32, i32
  }
  func.func @transform_3(%arg0: i32) -> (i32, i32) {
    %c0_i32 = arith.constant 0 : i32
    %c0_i32_0 = arith.constant 0 : i32
    return %c0_i32, %arg0 : i32, i32
  }
  func.func @transform_4(%arg0: i32) -> (i32, i32) {
    %c0_i32 = arith.constant 0 : i32
    %c0_i32_0 = arith.constant 0 : i32
    return %c0_i32, %arg0 : i32, i32
  }
  func.func @transform_5(%arg0: i32) -> (i32, i32, i32) {
    %c0_i32 = arith.constant 0 : i32
    %c0_i32_0 = arith.constant 0 : i32
    %c0_i32_1 = arith.constant 0 : i32
    return %c0_i32, %c0_i32_0, %arg0 : i32, i32, i32
  }
}

module attributes {stable_mosaic.version = 11 : i64} {
  func.func @_down_conv_bn_relu_kernel(%arg0: i32, %arg1: memref<2x4x16xbf16, #tpu.memory_space<vmem>>, %arg2: memref<16x16xbf16, #tpu.memory_space<vmem>>, %arg3: memref<8x16xbf16, #tpu.memory_space<vmem>>, %arg4: memref<1x16xf32, #tpu.memory_space<vmem>>, %arg5: memref<1x16xf32, #tpu.memory_space<vmem>>, %arg6: memref<2x4x16xbf16, #tpu.memory_space<vmem>>) attributes {dimension_semantics = [#tpu.dimension_semantics<parallel>], iteration_bounds = array<i64: 1>, scalar_prefetch = 0 : i64, scratch_operands = 0 : i64, tpu.core_type = #tpu.core_type<tc>, window_params = [{pipeline_mode = #tpu.pipeline_mode<synchronous>, transform_indices = @transform_0, window_bounds = array<i64: 2, 4, 16>}, {transform_indices = @transform_1, window_bounds = array<i64: 16, 16>}, {transform_indices = @transform_2, window_bounds = array<i64: 8, 16>}, {transform_indices = @transform_3, window_bounds = array<i64: 1, 16>}, {transform_indices = @transform_4, window_bounds = array<i64: 1, 16>}, {transform_indices = @transform_5, window_bounds = array<i64: 2, 4, 16>}]} {
    %c0 = arith.constant 0 : index
    %c0_0 = arith.constant 0 : index
    %c0_1 = arith.constant 0 : index
    %0 = vector.load %arg1[%c0, %c0_0, %c0_1] : memref<2x4x16xbf16, #tpu.memory_space<vmem>>, vector<2x4x16xbf16>
    %c0_2 = arith.constant 0 : index
    %c0_3 = arith.constant 0 : index
    %1 = vector.load %arg2[%c0_2, %c0_3] : memref<16x16xbf16, #tpu.memory_space<vmem>>, vector<16x16xbf16>
    "tpu.trace_start"() <{level = 10 : i32, message = "blk,kn->bln"}> : () -> ()
    %cst = arith.constant dense<0.000000e+00> : vector<2x4x16xf32>
    %2 = tpu.matmul %0, %1, %cst {dimension_numbers = #tpu.dot_dimension_numbers<[2], [0], [0, 1], [1], [0, 0, 0, 1, 1, 1], [], []>} : vector<2x4x16xbf16>, vector<16x16xbf16>, vector<2x4x16xf32> -> vector<2x4x16xf32>
    "tpu.trace_stop"() : () -> ()
    %3 = vector.extract_strided_slice %0 {offsets = [0, 0, 8], sizes = [2, 4, 8], strides = [1, 1, 1]} : vector<2x4x16xbf16> to vector<2x4x8xbf16>
    %c0_4 = arith.constant 0 : index
    %c0_5 = arith.constant 0 : index
    %4 = vector.load %arg3[%c0_4, %c0_5] : memref<8x16xbf16, #tpu.memory_space<vmem>>, vector<8x16xbf16>
    "tpu.trace_start"() <{level = 10 : i32, message = "blk,kn->bln"}> : () -> ()
    %cst_6 = arith.constant dense<0.000000e+00> : vector<2x4x16xf32>
    %5 = tpu.matmul %3, %4, %cst_6 {dimension_numbers = #tpu.dot_dimension_numbers<[2], [0], [0, 1], [1], [0, 0, 0, 1, 1, 1], [], []>} : vector<2x4x8xbf16>, vector<8x16xbf16>, vector<2x4x16xf32> -> vector<2x4x16xf32>
    "tpu.trace_stop"() : () -> ()
    %6 = vector.extract_strided_slice %5 {offsets = [0, 3, 0], sizes = [2, 1, 16], strides = [1, 1, 1]} : vector<2x4x16xf32> to vector<2x1x16xf32>
    %7 = vector.extract_strided_slice %5 {offsets = [0, 0, 0], sizes = [2, 3, 16], strides = [1, 1, 1]} : vector<2x4x16xf32> to vector<2x3x16xf32>
    %8 = tpu.concatenate %6, %7 in 1 : vector<2x1x16xf32>, vector<2x3x16xf32> -> vector<2x4x16xf32>
    %9 = arith.addf %2, %8 : vector<2x4x16xf32>
    %cst_7 = arith.constant dense<0.000000e+00> : vector<2x16xf32>
    %10 = vector.multi_reduction <add>, %9, %cst_7 [1] : vector<2x4x16xf32> to vector<2x16xf32>
    %11 = vector.shape_cast %10 : vector<2x16xf32> to vector<2x1x16xf32>
    %cst_8 = arith.constant dense<0.000000e+00> : vector<1x16xf32>
    %12 = vector.multi_reduction <add>, %11, %cst_8 [0] : vector<2x1x16xf32> to vector<1x16xf32>
    %13 = vector.shape_cast %12 : vector<1x16xf32> to vector<1x1x16xf32>
    %14 = arith.mulf %9, %9 : vector<2x4x16xf32>
    %cst_9 = arith.constant dense<0.000000e+00> : vector<2x16xf32>
    %15 = vector.multi_reduction <add>, %14, %cst_9 [1] : vector<2x4x16xf32> to vector<2x16xf32>
    %16 = vector.shape_cast %15 : vector<2x16xf32> to vector<2x1x16xf32>
    %cst_10 = arith.constant dense<0.000000e+00> : vector<1x16xf32>
    %17 = vector.multi_reduction <add>, %16, %cst_10 [0] : vector<2x1x16xf32> to vector<1x16xf32>
    %18 = vector.shape_cast %17 : vector<1x16xf32> to vector<1x1x16xf32>
    %cst_11 = arith.constant 8.000000e+00 : f32
    %19 = vector.broadcast %cst_11 : f32 to vector<1x1x16xf32>
    %20 = arith.divf %13, %19 : vector<1x1x16xf32>
    %cst_12 = arith.constant 8.000000e+00 : f32
    %21 = vector.broadcast %cst_12 : f32 to vector<1x1x16xf32>
    %22 = arith.divf %18, %21 : vector<1x1x16xf32>
    %23 = arith.mulf %20, %20 : vector<1x1x16xf32>
    %24 = arith.subf %22, %23 : vector<1x1x16xf32>
    %cst_13 = arith.constant 0.000000e+00 : f32
    %25 = vector.broadcast %cst_13 : f32 to vector<1x1x16xf32>
    %26 = arith.maximumf %24, %25 : vector<1x1x16xf32>
    %c0_14 = arith.constant 0 : index
    %c0_15 = arith.constant 0 : index
    %27 = vector.load %arg4[%c0_14, %c0_15] : memref<1x16xf32, #tpu.memory_space<vmem>>, vector<1x16xf32>
    %cst_16 = arith.constant 9.99999974E-6 : f32
    %28 = vector.broadcast %cst_16 : f32 to vector<1x1x16xf32>
    %29 = arith.addf %26, %28 : vector<1x1x16xf32>
    %30 = math.rsqrt %29 : vector<1x1x16xf32>
    %31 = vector.shape_cast %27 : vector<1x16xf32> to vector<1x1x16xf32>
    %32 = arith.mulf %31, %30 : vector<1x1x16xf32>
    %c0_17 = arith.constant 0 : index
    %c0_18 = arith.constant 0 : index
    %33 = vector.load %arg5[%c0_17, %c0_18] : memref<1x16xf32, #tpu.memory_space<vmem>>, vector<1x16xf32>
    %34 = arith.mulf %20, %32 : vector<1x1x16xf32>
    %35 = vector.shape_cast %33 : vector<1x16xf32> to vector<1x1x16xf32>
    %36 = arith.subf %35, %34 : vector<1x1x16xf32>
    %37 = vector.broadcast %32 : vector<1x1x16xf32> to vector<2x4x16xf32>
    %38 = arith.mulf %9, %37 : vector<2x4x16xf32>
    %39 = vector.broadcast %36 : vector<1x1x16xf32> to vector<2x4x16xf32>
    %40 = arith.addf %38, %39 : vector<2x4x16xf32>
    %cst_19 = arith.constant 0.000000e+00 : f32
    %41 = vector.broadcast %cst_19 : f32 to vector<2x4x16xf32>
    %42 = arith.maximumf %40, %41 : vector<2x4x16xf32>
    %43 = arith.truncf %42 : vector<2x4x16xf32> to vector<2x4x16xbf16>
    %c0_20 = arith.constant 0 : index
    %c0_21 = arith.constant 0 : index
    %c0_22 = arith.constant 0 : index
    %44 = vector.load %arg6[%c0_20, %c0_21, %c0_22] : memref<2x4x16xbf16, #tpu.memory_space<vmem>>, vector<2x4x16xbf16>
    tpu.vector_store %arg6[%c0_20, %c0_21, %c0_22], %43 {strides = array<i32>} : memref<2x4x16xbf16, #tpu.memory_space<vmem>>, vector<2x4x16xbf16>,
    return
  }
  func.func @transform_0(%arg0: i32) -> (i32, i32, i32) {
    %c0_i32 = arith.constant 0 : i32
    %c0_i32_0 = arith.constant 0 : i32
    %c0_i32_1 = arith.constant 0 : i32
    %c0_i32_2 = arith.constant 0 : i32
    return %c0_i32, %c0_i32_0, %c0_i32_1 : i32, i32, i32
  }
  func.func @transform_1(%arg0: i32) -> (i32, i32) {
    %c0_i32 = arith.constant 0 : i32
    %c0_i32_0 = arith.constant 0 : i32
    return %c0_i32, %arg0 : i32, i32
  }
  func.func @transform_2(%arg0: i32) -> (i32, i32) {
    %c0_i32 = arith.constant 0 : i32
    %c0_i32_0 = arith.constant 0 : i32
    return %c0_i32, %arg0 : i32, i32
  }
  func.func @transform_3(%arg0: i32) -> (i32, i32) {
    %c0_i32 = arith.constant 0 : i32
    %c0_i32_0 = arith.constant 0 : i32
    return %c0_i32, %arg0 : i32, i32
  }
  func.func @transform_4(%arg0: i32) -> (i32, i32) {
    %c0_i32 = arith.constant 0 : i32
    %c0_i32_0 = arith.constant 0 : i32
    return %c0_i32, %arg0 : i32, i32
  }
  func.func @transform_5(%arg0: i32) -> (i32, i32, i32) {
    %c0_i32 = arith.constant 0 : i32
    %c0_i32_0 = arith.constant 0 : i32
    %c0_i32_1 = arith.constant 0 : i32
    return %c0_i32, %c0_i32_0, %arg0 : i32, i32, i32
  }
}

module attributes {stable_mosaic.version = 11 : i64} {
  func.func @_up_conv_bn_relu_kernel(%arg0: i32, %arg1: memref<2x4x16xbf16, #tpu.memory_space<vmem>>, %arg2: memref<16x24xbf16, #tpu.memory_space<vmem>>, %arg3: memref<1x8xf32, #tpu.memory_space<vmem>>, %arg4: memref<1x8xf32, #tpu.memory_space<vmem>>, %arg5: memref<2x4x8xbf16, #tpu.memory_space<vmem>>, %arg6: memref<2x4x8xbf16, #tpu.memory_space<vmem>>) attributes {dimension_semantics = [#tpu.dimension_semantics<parallel>], iteration_bounds = array<i64: 1>, scalar_prefetch = 0 : i64, scratch_operands = 0 : i64, tpu.core_type = #tpu.core_type<tc>, window_params = [{pipeline_mode = #tpu.pipeline_mode<synchronous>, transform_indices = @transform_0, window_bounds = array<i64: 2, 4, 16>}, {transform_indices = @transform_1, window_bounds = array<i64: 16, 24>}, {transform_indices = @transform_2, window_bounds = array<i64: 1, 8>}, {transform_indices = @transform_3, window_bounds = array<i64: 1, 8>}, {transform_indices = @transform_4, window_bounds = array<i64: 2, 4, 8>}, {transform_indices = @transform_5, window_bounds = array<i64: 2, 4, 8>}]} {
    %c0 = arith.constant 0 : index
    %c0_0 = arith.constant 0 : index
    %c0_1 = arith.constant 0 : index
    %0 = vector.load %arg1[%c0, %c0_0, %c0_1] : memref<2x4x16xbf16, #tpu.memory_space<vmem>>, vector<2x4x16xbf16>
    %c0_2 = arith.constant 0 : index
    %c0_3 = arith.constant 0 : index
    %1 = vector.load %arg2[%c0_2, %c0_3] : memref<16x24xbf16, #tpu.memory_space<vmem>>, vector<16x24xbf16>
    "tpu.trace_start"() <{level = 10 : i32, message = "blc,cn->bln"}> : () -> ()
    %cst = arith.constant dense<0.000000e+00> : vector<2x4x24xf32>
    %2 = tpu.matmul %0, %1, %cst {dimension_numbers = #tpu.dot_dimension_numbers<[2], [0], [0, 1], [1], [0, 0, 0, 1, 1, 1], [], []>} : vector<2x4x16xbf16>, vector<16x24xbf16>, vector<2x4x24xf32> -> vector<2x4x24xf32>
    "tpu.trace_stop"() : () -> ()
    %3 = vector.extract_strided_slice %2 {offsets = [0, 0, 0], sizes = [2, 4, 8], strides = [1, 1, 1]} : vector<2x4x24xf32> to vector<2x4x8xf32>
    %4 = vector.extract_strided_slice %2 {offsets = [0, 0, 8], sizes = [2, 4, 8], strides = [1, 1, 1]} : vector<2x4x24xf32> to vector<2x4x8xf32>
    %5 = vector.extract_strided_slice %2 {offsets = [0, 0, 16], sizes = [2, 4, 8], strides = [1, 1, 1]} : vector<2x4x24xf32> to vector<2x4x8xf32>
    %6 = vector.extract_strided_slice %3 {offsets = [0, 1, 0], sizes = [2, 3, 8], strides = [1, 1, 1]} : vector<2x4x8xf32> to vector<2x3x8xf32>
    %7 = vector.extract_strided_slice %5 {offsets = [0, 0, 0], sizes = [2, 3, 8], strides = [1, 1, 1]} : vector<2x4x8xf32> to vector<2x3x8xf32>
    %8 = arith.addf %6, %7 : vector<2x3x8xf32>
    %cst_4 = arith.constant 0.000000e+00 : f32
    %9 = vector.broadcast %cst_4 : f32 to vector<2x1x8xf32>
    %10 = tpu.concatenate %8, %9 in 1 : vector<2x3x8xf32>, vector<2x1x8xf32> -> vector<2x4x8xf32>
    %cst_5 = arith.constant dense<0.000000e+00> : vector<2x8xf32>
    %11 = vector.multi_reduction <add>, %4, %cst_5 [1] : vector<2x4x8xf32> to vector<2x8xf32>
    %12 = vector.shape_cast %11 : vector<2x8xf32> to vector<2x1x8xf32>
    %cst_6 = arith.constant dense<0.000000e+00> : vector<1x8xf32>
    %13 = vector.multi_reduction <add>, %12, %cst_6 [0] : vector<2x1x8xf32> to vector<1x8xf32>
    %14 = vector.shape_cast %13 : vector<1x8xf32> to vector<1x1x8xf32>
    %cst_7 = arith.constant dense<0.000000e+00> : vector<2x8xf32>
    %15 = vector.multi_reduction <add>, %10, %cst_7 [1] : vector<2x4x8xf32> to vector<2x8xf32>
    %16 = vector.shape_cast %15 : vector<2x8xf32> to vector<2x1x8xf32>
    %cst_8 = arith.constant dense<0.000000e+00> : vector<1x8xf32>
    %17 = vector.multi_reduction <add>, %16, %cst_8 [0] : vector<2x1x8xf32> to vector<1x8xf32>
    %18 = vector.shape_cast %17 : vector<1x8xf32> to vector<1x1x8xf32>
    %19 = arith.addf %14, %18 : vector<1x1x8xf32>
    %20 = arith.mulf %4, %4 : vector<2x4x8xf32>
    %cst_9 = arith.constant dense<0.000000e+00> : vector<2x8xf32>
    %21 = vector.multi_reduction <add>, %20, %cst_9 [1] : vector<2x4x8xf32> to vector<2x8xf32>
    %22 = vector.shape_cast %21 : vector<2x8xf32> to vector<2x1x8xf32>
    %cst_10 = arith.constant dense<0.000000e+00> : vector<1x8xf32>
    %23 = vector.multi_reduction <add>, %22, %cst_10 [0] : vector<2x1x8xf32> to vector<1x8xf32>
    %24 = vector.shape_cast %23 : vector<1x8xf32> to vector<1x1x8xf32>
    %25 = arith.mulf %10, %10 : vector<2x4x8xf32>
    %cst_11 = arith.constant dense<0.000000e+00> : vector<2x8xf32>
    %26 = vector.multi_reduction <add>, %25, %cst_11 [1] : vector<2x4x8xf32> to vector<2x8xf32>
    %27 = vector.shape_cast %26 : vector<2x8xf32> to vector<2x1x8xf32>
    %cst_12 = arith.constant dense<0.000000e+00> : vector<1x8xf32>
    %28 = vector.multi_reduction <add>, %27, %cst_12 [0] : vector<2x1x8xf32> to vector<1x8xf32>
    %29 = vector.shape_cast %28 : vector<1x8xf32> to vector<1x1x8xf32>
    %30 = arith.addf %24, %29 : vector<1x1x8xf32>
    %cst_13 = arith.constant 1.400000e+01 : f32
    %31 = vector.broadcast %cst_13 : f32 to vector<1x1x8xf32>
    %32 = arith.divf %19, %31 : vector<1x1x8xf32>
    %cst_14 = arith.constant 1.400000e+01 : f32
    %33 = vector.broadcast %cst_14 : f32 to vector<1x1x8xf32>
    %34 = arith.divf %30, %33 : vector<1x1x8xf32>
    %35 = arith.mulf %32, %32 : vector<1x1x8xf32>
    %36 = arith.subf %34, %35 : vector<1x1x8xf32>
    %cst_15 = arith.constant 0.000000e+00 : f32
    %37 = vector.broadcast %cst_15 : f32 to vector<1x1x8xf32>
    %38 = arith.maximumf %36, %37 : vector<1x1x8xf32>
    %c0_16 = arith.constant 0 : index
    %c0_17 = arith.constant 0 : index
    %39 = vector.load %arg3[%c0_16, %c0_17] : memref<1x8xf32, #tpu.memory_space<vmem>>, vector<1x8xf32>
    %cst_18 = arith.constant 9.99999974E-6 : f32
    %40 = vector.broadcast %cst_18 : f32 to vector<1x1x8xf32>
    %41 = arith.addf %38, %40 : vector<1x1x8xf32>
    %42 = math.rsqrt %41 : vector<1x1x8xf32>
    %43 = vector.shape_cast %39 : vector<1x8xf32> to vector<1x1x8xf32>
    %44 = arith.mulf %43, %42 : vector<1x1x8xf32>
    %c0_19 = arith.constant 0 : index
    %c0_20 = arith.constant 0 : index
    %45 = vector.load %arg4[%c0_19, %c0_20] : memref<1x8xf32, #tpu.memory_space<vmem>>, vector<1x8xf32>
    %46 = arith.mulf %32, %44 : vector<1x1x8xf32>
    %47 = vector.shape_cast %45 : vector<1x8xf32> to vector<1x1x8xf32>
    %48 = arith.subf %47, %46 : vector<1x1x8xf32>
    %49 = vector.broadcast %44 : vector<1x1x8xf32> to vector<2x4x8xf32>
    %50 = arith.mulf %4, %49 : vector<2x4x8xf32>
    %51 = vector.broadcast %48 : vector<1x1x8xf32> to vector<2x4x8xf32>
    %52 = arith.addf %50, %51 : vector<2x4x8xf32>
    %cst_21 = arith.constant 0.000000e+00 : f32
    %53 = vector.broadcast %cst_21 : f32 to vector<2x4x8xf32>
    %54 = arith.maximumf %52, %53 : vector<2x4x8xf32>
    %55 = arith.truncf %54 : vector<2x4x8xf32> to vector<2x4x8xbf16>
    %c0_22 = arith.constant 0 : index
    %c0_23 = arith.constant 0 : index
    %c0_24 = arith.constant 0 : index
    %56 = vector.load %arg5[%c0_22, %c0_23, %c0_24] : memref<2x4x8xbf16, #tpu.memory_space<vmem>>, vector<2x4x8xbf16>
    tpu.vector_store %arg5[%c0_22, %c0_23, %c0_24], %55 {strides = array<i32>} : memref<2x4x8xbf16, #tpu.memory_space<vmem>>, vector<2x4x8xbf16>,
    %57 = vector.broadcast %44 : vector<1x1x8xf32> to vector<2x4x8xf32>
    %58 = arith.mulf %10, %57 : vector<2x4x8xf32>
    %59 = vector.broadcast %48 : vector<1x1x8xf32> to vector<2x4x8xf32>
    %60 = arith.addf %58, %59 : vector<2x4x8xf32>
    %cst_25 = arith.constant 0.000000e+00 : f32
    %61 = vector.broadcast %cst_25 : f32 to vector<2x4x8xf32>
    %62 = arith.maximumf %60, %61 : vector<2x4x8xf32>
    %63 = arith.truncf %62 : vector<2x4x8xf32> to vector<2x4x8xbf16>
    %c0_26 = arith.constant 0 : index
    %c0_27 = arith.constant 0 : index
    %c0_28 = arith.constant 0 : index
    %64 = vector.load %arg6[%c0_26, %c0_27, %c0_28] : memref<2x4x8xbf16, #tpu.memory_space<vmem>>, vector<2x4x8xbf16>
    tpu.vector_store %arg6[%c0_26, %c0_27, %c0_28], %63 {strides = array<i32>} : memref<2x4x8xbf16, #tpu.memory_space<vmem>>, vector<2x4x8xbf16>,
    return
  }
  func.func @transform_0(%arg0: i32) -> (i32, i32, i32) {
    %c0_i32 = arith.constant 0 : i32
    %c0_i32_0 = arith.constant 0 : i32
    %c0_i32_1 = arith.constant 0 : i32
    %c0_i32_2 = arith.constant 0 : i32
    return %c0_i32, %c0_i32_0, %c0_i32_1 : i32, i32, i32
  }
  func.func @transform_1(%arg0: i32) -> (i32, i32) {
    %c0_i32 = arith.constant 0 : i32
    %c0_i32_0 = arith.constant 0 : i32
    return %c0_i32, %arg0 : i32, i32
  }
  func.func @transform_2(%arg0: i32) -> (i32, i32) {
    %c0_i32 = arith.constant 0 : i32
    %c0_i32_0 = arith.constant 0 : i32
    return %c0_i32, %arg0 : i32, i32
  }
  func.func @transform_3(%arg0: i32) -> (i32, i32) {
    %c0_i32 = arith.constant 0 : i32
    %c0_i32_0 = arith.constant 0 : i32
    return %c0_i32, %arg0 : i32, i32
  }
  func.func @transform_4(%arg0: i32) -> (i32, i32, i32) {
    %c0_i32 = arith.constant 0 : i32
    %c0_i32_0 = arith.constant 0 : i32
    %c0_i32_1 = arith.constant 0 : i32
    return %c0_i32, %c0_i32_0, %arg0 : i32, i32, i32
  }
  func.func @transform_5(%arg0: i32) -> (i32, i32, i32) {
    %c0_i32 = arith.constant 0 : i32
    %c0_i32_0 = arith.constant 0 : i32
    %c0_i32_1 = arith.constant 0 : i32
    return %c0_i32, %c0_i32_0, %arg0 : i32, i32, i32
  }
}

module attributes {stable_mosaic.version = 11 : i64} {
  func.func @_up_conv_bn_relu_kernel(%arg0: i32, %arg1: memref<2x7x8xbf16, #tpu.memory_space<vmem>>, %arg2: memref<8x12xbf16, #tpu.memory_space<vmem>>, %arg3: memref<1x4xf32, #tpu.memory_space<vmem>>, %arg4: memref<1x4xf32, #tpu.memory_space<vmem>>, %arg5: memref<2x7x4xbf16, #tpu.memory_space<vmem>>, %arg6: memref<2x7x4xbf16, #tpu.memory_space<vmem>>) attributes {dimension_semantics = [#tpu.dimension_semantics<parallel>], iteration_bounds = array<i64: 1>, scalar_prefetch = 0 : i64, scratch_operands = 0 : i64, tpu.core_type = #tpu.core_type<tc>, window_params = [{pipeline_mode = #tpu.pipeline_mode<synchronous>, transform_indices = @transform_0, window_bounds = array<i64: 2, 7, 8>}, {transform_indices = @transform_1, window_bounds = array<i64: 8, 12>}, {transform_indices = @transform_2, window_bounds = array<i64: 1, 4>}, {transform_indices = @transform_3, window_bounds = array<i64: 1, 4>}, {transform_indices = @transform_4, window_bounds = array<i64: 2, 7, 4>}, {transform_indices = @transform_5, window_bounds = array<i64: 2, 7, 4>}]} {
    %c0 = arith.constant 0 : index
    %c0_0 = arith.constant 0 : index
    %c0_1 = arith.constant 0 : index
    %0 = vector.load %arg1[%c0, %c0_0, %c0_1] : memref<2x7x8xbf16, #tpu.memory_space<vmem>>, vector<2x7x8xbf16>
    %c0_2 = arith.constant 0 : index
    %c0_3 = arith.constant 0 : index
    %1 = vector.load %arg2[%c0_2, %c0_3] : memref<8x12xbf16, #tpu.memory_space<vmem>>, vector<8x12xbf16>
    "tpu.trace_start"() <{level = 10 : i32, message = "blc,cn->bln"}> : () -> ()
    %cst = arith.constant dense<0.000000e+00> : vector<2x7x12xf32>
    %2 = tpu.matmul %0, %1, %cst {dimension_numbers = #tpu.dot_dimension_numbers<[2], [0], [0, 1], [1], [0, 0, 0, 1, 1, 1], [], []>} : vector<2x7x8xbf16>, vector<8x12xbf16>, vector<2x7x12xf32> -> vector<2x7x12xf32>
    "tpu.trace_stop"() : () -> ()
    %3 = vector.extract_strided_slice %2 {offsets = [0, 0, 0], sizes = [2, 7, 4], strides = [1, 1, 1]} : vector<2x7x12xf32> to vector<2x7x4xf32>
    %4 = vector.extract_strided_slice %2 {offsets = [0, 0, 4], sizes = [2, 7, 4], strides = [1, 1, 1]} : vector<2x7x12xf32> to vector<2x7x4xf32>
    %5 = vector.extract_strided_slice %2 {offsets = [0, 0, 8], sizes = [2, 7, 4], strides = [1, 1, 1]} : vector<2x7x12xf32> to vector<2x7x4xf32>
    %6 = vector.extract_strided_slice %3 {offsets = [0, 1, 0], sizes = [2, 6, 4], strides = [1, 1, 1]} : vector<2x7x4xf32> to vector<2x6x4xf32>
    %7 = vector.extract_strided_slice %5 {offsets = [0, 0, 0], sizes = [2, 6, 4], strides = [1, 1, 1]} : vector<2x7x4xf32> to vector<2x6x4xf32>
    %8 = arith.addf %6, %7 : vector<2x6x4xf32>
    %cst_4 = arith.constant 0.000000e+00 : f32
    %9 = vector.broadcast %cst_4 : f32 to vector<2x1x4xf32>
    %10 = tpu.concatenate %8, %9 in 1 : vector<2x6x4xf32>, vector<2x1x4xf32> -> vector<2x7x4xf32>
    %cst_5 = arith.constant dense<0.000000e+00> : vector<2x4xf32>
    %11 = vector.multi_reduction <add>, %4, %cst_5 [1] : vector<2x7x4xf32> to vector<2x4xf32>
    %12 = vector.shape_cast %11 : vector<2x4xf32> to vector<2x1x4xf32>
    %cst_6 = arith.constant dense<0.000000e+00> : vector<1x4xf32>
    %13 = vector.multi_reduction <add>, %12, %cst_6 [0] : vector<2x1x4xf32> to vector<1x4xf32>
    %14 = vector.shape_cast %13 : vector<1x4xf32> to vector<1x1x4xf32>
    %cst_7 = arith.constant dense<0.000000e+00> : vector<2x4xf32>
    %15 = vector.multi_reduction <add>, %10, %cst_7 [1] : vector<2x7x4xf32> to vector<2x4xf32>
    %16 = vector.shape_cast %15 : vector<2x4xf32> to vector<2x1x4xf32>
    %cst_8 = arith.constant dense<0.000000e+00> : vector<1x4xf32>
    %17 = vector.multi_reduction <add>, %16, %cst_8 [0] : vector<2x1x4xf32> to vector<1x4xf32>
    %18 = vector.shape_cast %17 : vector<1x4xf32> to vector<1x1x4xf32>
    %19 = arith.addf %14, %18 : vector<1x1x4xf32>
    %20 = arith.mulf %4, %4 : vector<2x7x4xf32>
    %cst_9 = arith.constant dense<0.000000e+00> : vector<2x4xf32>
    %21 = vector.multi_reduction <add>, %20, %cst_9 [1] : vector<2x7x4xf32> to vector<2x4xf32>
    %22 = vector.shape_cast %21 : vector<2x4xf32> to vector<2x1x4xf32>
    %cst_10 = arith.constant dense<0.000000e+00> : vector<1x4xf32>
    %23 = vector.multi_reduction <add>, %22, %cst_10 [0] : vector<2x1x4xf32> to vector<1x4xf32>
    %24 = vector.shape_cast %23 : vector<1x4xf32> to vector<1x1x4xf32>
    %25 = arith.mulf %10, %10 : vector<2x7x4xf32>
    %cst_11 = arith.constant dense<0.000000e+00> : vector<2x4xf32>
    %26 = vector.multi_reduction <add>, %25, %cst_11 [1] : vector<2x7x4xf32> to vector<2x4xf32>
    %27 = vector.shape_cast %26 : vector<2x4xf32> to vector<2x1x4xf32>
    %cst_12 = arith.constant dense<0.000000e+00> : vector<1x4xf32>
    %28 = vector.multi_reduction <add>, %27, %cst_12 [0] : vector<2x1x4xf32> to vector<1x4xf32>
    %29 = vector.shape_cast %28 : vector<1x4xf32> to vector<1x1x4xf32>
    %30 = arith.addf %24, %29 : vector<1x1x4xf32>
    %cst_13 = arith.constant 2.600000e+01 : f32
    %31 = vector.broadcast %cst_13 : f32 to vector<1x1x4xf32>
    %32 = arith.divf %19, %31 : vector<1x1x4xf32>
    %cst_14 = arith.constant 2.600000e+01 : f32
    %33 = vector.broadcast %cst_14 : f32 to vector<1x1x4xf32>
    %34 = arith.divf %30, %33 : vector<1x1x4xf32>
    %35 = arith.mulf %32, %32 : vector<1x1x4xf32>
    %36 = arith.subf %34, %35 : vector<1x1x4xf32>
    %cst_15 = arith.constant 0.000000e+00 : f32
    %37 = vector.broadcast %cst_15 : f32 to vector<1x1x4xf32>
    %38 = arith.maximumf %36, %37 : vector<1x1x4xf32>
    %c0_16 = arith.constant 0 : index
    %c0_17 = arith.constant 0 : index
    %39 = vector.load %arg3[%c0_16, %c0_17] : memref<1x4xf32, #tpu.memory_space<vmem>>, vector<1x4xf32>
    %cst_18 = arith.constant 9.99999974E-6 : f32
    %40 = vector.broadcast %cst_18 : f32 to vector<1x1x4xf32>
    %41 = arith.addf %38, %40 : vector<1x1x4xf32>
    %42 = math.rsqrt %41 : vector<1x1x4xf32>
    %43 = vector.shape_cast %39 : vector<1x4xf32> to vector<1x1x4xf32>
    %44 = arith.mulf %43, %42 : vector<1x1x4xf32>
    %c0_19 = arith.constant 0 : index
    %c0_20 = arith.constant 0 : index
    %45 = vector.load %arg4[%c0_19, %c0_20] : memref<1x4xf32, #tpu.memory_space<vmem>>, vector<1x4xf32>
    %46 = arith.mulf %32, %44 : vector<1x1x4xf32>
    %47 = vector.shape_cast %45 : vector<1x4xf32> to vector<1x1x4xf32>
    %48 = arith.subf %47, %46 : vector<1x1x4xf32>
    %49 = vector.broadcast %44 : vector<1x1x4xf32> to vector<2x7x4xf32>
    %50 = arith.mulf %4, %49 : vector<2x7x4xf32>
    %51 = vector.broadcast %48 : vector<1x1x4xf32> to vector<2x7x4xf32>
    %52 = arith.addf %50, %51 : vector<2x7x4xf32>
    %cst_21 = arith.constant 0.000000e+00 : f32
    %53 = vector.broadcast %cst_21 : f32 to vector<2x7x4xf32>
    %54 = arith.maximumf %52, %53 : vector<2x7x4xf32>
    %55 = arith.truncf %54 : vector<2x7x4xf32> to vector<2x7x4xbf16>
    %c0_22 = arith.constant 0 : index
    %c0_23 = arith.constant 0 : index
    %c0_24 = arith.constant 0 : index
    %56 = vector.load %arg5[%c0_22, %c0_23, %c0_24] : memref<2x7x4xbf16, #tpu.memory_space<vmem>>, vector<2x7x4xbf16>
    tpu.vector_store %arg5[%c0_22, %c0_23, %c0_24], %55 {strides = array<i32>} : memref<2x7x4xbf16, #tpu.memory_space<vmem>>, vector<2x7x4xbf16>,
    %57 = vector.broadcast %44 : vector<1x1x4xf32> to vector<2x7x4xf32>
    %58 = arith.mulf %10, %57 : vector<2x7x4xf32>
    %59 = vector.broadcast %48 : vector<1x1x4xf32> to vector<2x7x4xf32>
    %60 = arith.addf %58, %59 : vector<2x7x4xf32>
    %cst_25 = arith.constant 0.000000e+00 : f32
    %61 = vector.broadcast %cst_25 : f32 to vector<2x7x4xf32>
    %62 = arith.maximumf %60, %61 : vector<2x7x4xf32>
    %63 = arith.truncf %62 : vector<2x7x4xf32> to vector<2x7x4xbf16>
    %c0_26 = arith.constant 0 : index
    %c0_27 = arith.constant 0 : index
    %c0_28 = arith.constant 0 : index
    %64 = vector.load %arg6[%c0_26, %c0_27, %c0_28] : memref<2x7x4xbf16, #tpu.memory_space<vmem>>, vector<2x7x4xbf16>
    tpu.vector_store %arg6[%c0_26, %c0_27, %c0_28], %63 {strides = array<i32>} : memref<2x7x4xbf16, #tpu.memory_space<vmem>>, vector<2x7x4xbf16>,
    return
  }
  func.func @transform_0(%arg0: i32) -> (i32, i32, i32) {
    %c0_i32 = arith.constant 0 : i32
    %c0_i32_0 = arith.constant 0 : i32
    %c0_i32_1 = arith.constant 0 : i32
    %c0_i32_2 = arith.constant 0 : i32
    return %c0_i32, %c0_i32_0, %c0_i32_1 : i32, i32, i32
  }
  func.func @transform_1(%arg0: i32) -> (i32, i32) {
    %c0_i32 = arith.constant 0 : i32
    %c0_i32_0 = arith.constant 0 : i32
    return %c0_i32, %arg0 : i32, i32
  }
  func.func @transform_2(%arg0: i32) -> (i32, i32) {
    %c0_i32 = arith.constant 0 : i32
    %c0_i32_0 = arith.constant 0 : i32
    return %c0_i32, %arg0 : i32, i32
  }
  func.func @transform_3(%arg0: i32) -> (i32, i32) {
    %c0_i32 = arith.constant 0 : i32
    %c0_i32_0 = arith.constant 0 : i32
    return %c0_i32, %arg0 : i32, i32
  }
  func.func @transform_4(%arg0: i32) -> (i32, i32, i32) {
    %c0_i32 = arith.constant 0 : i32
    %c0_i32_0 = arith.constant 0 : i32
    %c0_i32_1 = arith.constant 0 : i32
    return %c0_i32, %c0_i32_0, %arg0 : i32, i32, i32
  }
  func.func @transform_5(%arg0: i32) -> (i32, i32, i32) {
    %c0_i32 = arith.constant 0 : i32
    %c0_i32_0 = arith.constant 0 : i32
    %c0_i32_1 = arith.constant 0 : i32
    return %c0_i32, %c0_i32_0, %arg0 : i32, i32, i32
  }
}

module attributes {stable_mosaic.version = 11 : i64} {
  func.func @_interp_matmul_kernel(%arg0: i32, %arg1: i32, %arg2: memref<16x13xf32, #tpu.memory_space<vmem>>, %arg3: memref<1x13x4xbf16, #tpu.memory_space<vmem>>, %arg4: memref<1x16x4xf32, #tpu.memory_space<vmem>>) attributes {dimension_semantics = [#tpu.dimension_semantics<parallel>, #tpu.dimension_semantics<parallel>], iteration_bounds = array<i64: 2, 1>, scalar_prefetch = 0 : i64, scratch_operands = 0 : i64, tpu.core_type = #tpu.core_type<tc>, window_params = [{pipeline_mode = #tpu.pipeline_mode<synchronous>, transform_indices = @transform_0, window_bounds = array<i64: 16, 13>}, {transform_indices = @transform_1, window_bounds = array<i64: 1, 13, 4>}, {transform_indices = @transform_2, window_bounds = array<i64: 1, 16, 4>}]} {
    %c0 = arith.constant 0 : index
    %c0_0 = arith.constant 0 : index
    %c0_1 = arith.constant 0 : index
    %0 = vector.load %arg3[%c0, %c0_0, %c0_1] : memref<1x13x4xbf16, #tpu.memory_space<vmem>>, vector<1x13x4xbf16>
    %1 = vector.shape_cast %0 : vector<1x13x4xbf16> to vector<13x4xbf16>
    %2 = arith.extf %1 : vector<13x4xbf16> to vector<13x4xf32>
    %c0_2 = arith.constant 0 : index
    %c0_3 = arith.constant 0 : index
    %3 = vector.load %arg2[%c0_2, %c0_3] : memref<16x13xf32, #tpu.memory_space<vmem>>, vector<16x13xf32>
    %cst = arith.constant dense<0.000000e+00> : vector<16x4xf32>
    %4 = tpu.matmul %3, %2, %cst {dimension_numbers = #tpu.dot_dimension_numbers<[1], [0], [0], [1], [0, 0, 1, 1], [], []>} : vector<16x13xf32>, vector<13x4xf32>, vector<16x4xf32> -> vector<16x4xf32>
    %c0_4 = arith.constant 0 : index
    %c0_5 = arith.constant 0 : index
    %c0_6 = arith.constant 0 : index
    %5 = vector.load %arg4[%c0_4, %c0_5, %c0_6] : memref<1x16x4xf32, #tpu.memory_space<vmem>>, vector<1x16x4xf32>
    %6 = vector.shape_cast %5 : vector<1x16x4xf32> to vector<16x4xf32>
    %7 = vector.shape_cast %4 : vector<16x4xf32> to vector<1x16x4xf32>
    tpu.vector_store %arg4[%c0_4, %c0_5, %c0_6], %7 {strides = array<i32>} : memref<1x16x4xf32, #tpu.memory_space<vmem>>, vector<1x16x4xf32>,
    return
  }
  func.func @transform_0(%arg0: i32, %arg1: i32) -> (i32, i32) {
    %c0_i32 = arith.constant 0 : i32
    %c0_i32_0 = arith.constant 0 : i32
    %c0_i32_1 = arith.constant 0 : i32
    return %c0_i32, %c0_i32_0 : i32, i32
  }
  func.func @transform_1(%arg0: i32, %arg1: i32) -> (i32, i32, i32) {
    %c0_i32 = arith.constant 0 : i32
    %c0_i32_0 = arith.constant 0 : i32
    return %arg0, %c0_i32, %arg1 : i32, i32, i32
  }
  func.func @transform_2(%arg0: i32, %arg1: i32) -> (i32, i32, i32) {
    %c0_i32 = arith.constant 0 : i32
    %c0_i32_0 = arith.constant 0 : i32
    return %arg0, %c0_i32, %arg1 : i32, i32, i32
  }
}

</mosaic_0001>

<bundles_post_ra>
// kernel: fcn_n_forward.6
= control target key start
LH: loop header
LB: loop body
LE: loop exit
PB: predicated region body
PF: predicated region fallthrough
CT: control target
= control target key end

     0   :  { %vm39_vm0 = vcmask 1043456   ;;  %s209_s24 = smov 120   ;;  %vm35_vm1 = vcmask 64512   ;;  %vm71_vm2 = vcmask 1040384   ;;  %vm91_vm3 = vcmask 130048   ;;  %s283_s0 = inlined_call_operand.vmem [shape: bf16[2,4,16], index: 0, kind: input, shape index: {}]   ;;  %s284_s2 = inlined_call_operand.vmem [shape: bf16[8,16], index: 2, kind: input, shape index: {}]   ;;  %s285_s1 = inlined_call_operand.vmem [shape: bf16[16,16], index: 1, kind: input, shape index: {}]   ;;  %s286_s3 = inlined_call_operand.vmem [shape: f32[1,16], index: 3, kind: input, shape index: {}]   ;;  %s287_s4 = inlined_call_operand.vmem [shape: f32[1,16], index: 4, kind: input, shape index: {}]   ;;  %s288_s5 = inlined_call_operand.vmem [shape: bf16[2,4,16], index: 5, kind: output, shape index: {}]  }
   0x1   :  { %v21_v0 = vld [vmem:[%s283_s0] sm:$0x3]  ;;  %v22_v1 = vld [vmem:[%s283_s0 + $0x2] sm:$0x3]  ;;  %v210_v19 = vmov 8.0   ;;  %vm110_vm4 = vcmask 125952  }
   0x2   :  { %v25_v2 = vld [vmem:[%s284_s2] sm:$0xf]  ;;  %27 = vst [vmem:[#allocation1] ss:$4 sm:$0xff] %v21_v0  ;;  %205 = vrcp.f32 %v210_v19  ;;  %vm189_vm9 = vcmask 123904  }
   0x3   :  { %v41_v3 = vsel %vm39_vm0, %v25_v2, 0  ;;  %30 = vst [vmem:[#allocation1 + $0x1] ss:$4 sm:$0xff] %v22_v1  ;;  %v202_v6 = vld [vmem:[%s285_s1] sm:$0xff] }
   0x4   :  { %50 = vmatpush.bf16.msra.mxu0 %v41_v3  ;;  %101 = vmatpush.bf16.msra.mxu1 %v202_v6 }
   0x8   :  { %v206_v20 = vpop.eup %205 }
   0x9   :  { %v148_v24 = vmul.f32 8.0, %v206_v20  ;;  %vm152_vm5 = vweird.f32 %v206_v20 }
   0xa   :  { %v31_v4 = vld.sshfl [vmem:[#allocation1] sm:$0xff pattern:$0x73625140] }
   0xb   :  { %33 = vrot.lane.b32.xlu0 %v31_v4, %s209_s24  ;;  %v149_v32 = vsub.f32 1.0, %v148_v24 }
   0xd   :  { %v150_v42 = vmul.f32 %v206_v20, %v149_v32 }
   0xf   :  { %v151_v51 = vadd.f32 %v206_v20, %v150_v42 }
  0x11   :  { %v153_v62 = vsel %vm152_vm5, %v206_v20, %v151_v51 }
  0x7d   :  { %v34_v5 = vpop.permute.xlu0 %33 }
  0x7e   :  { %196 = vmatmul.msk.bf16.vlgmr.msra.gmra.mxu0 %vm35_vm1, %v34_v5 }
  0xfb   :  { %v52_v7 = vpop.f32.mrf.mxu0 }
  0xfc   :  { %v57_v8 = vrot.slane %v52_v7, 4  ;;  %62 = vst [vmem:[#allocation1] ss:$2 sm:$0xff] %v52_v7  ;;  %v58_v14 = vperm.slane %v52_v7, 3 }
  0xfe   :  { %65 = vst [vmem:[#allocation1 + $0x10] ss:$2 sm:$0xff] %v57_v8  ;;  %v59_v15 = vperm.slane %v57_v8, 3 }
 0x103   :  { %v54_v9 = vpop.f32.mrf.mxu0  ;;  %v63_v10 = vld.sshfl [vmem:[#allocation1] sm:$0xff pattern:$0x75316420] }
 0x104   :  { %v67_v12 = vrot.slane %v63_v10, 7 }
 0x105   :  { %v66_v11 = vld.sshfl [vmem:[#allocation1 + $0x10] sm:$0xff pattern:$0x75316420] }
 0x106   :  { %74 = vst [vmem:[#allocation1] ss:$4 sm:$0xff] %v21_v0  ;;  %v68_v13 = vrot.slane %v66_v11, 7  ;;  %v72_v16 = vsel %vm71_vm2, %v58_v14, %v67_v12  ;;  %v159_v14 = vld [vmem:[%s286_s3] sm:$0x1] }
 0x107   :  { %76 = vst [vmem:[#allocation1 + $0x1] ss:$4 sm:$0xff] %v22_v1 }
 0x108   :  { %v73_v18 = vsel %vm71_vm2, %v59_v15, %v68_v13 }
 0x10e   :  { %v77_v17 = vld.sshfl [vmem:[#allocation1] sm:$0xff pattern:$0x73625140] }
 0x10f   :  { %86 = vst [vmem:[#allocation1] ss:$2 sm:$0xff] %v72_v16  ;;  %201 = vmatmul.msk.bf16.vlgmr.msra.gmra.mxu1 %vm91_vm3, %v77_v17 }
 0x110   :  { %88 = vst [vmem:[#allocation1 + $0x1] ss:$2 sm:$0xff] %v73_v18  ;;  %v172_v18 = vld [vmem:[%s287_s4] sm:$0x1] }
 0x117   :  { %v89_v21 = vld.sshfl [vmem:[#allocation1] sm:$0xff pattern:$0x75316420] }
 0x18c   :  { %v103_v22 = vpop.f32.mrf.mxu1 }
 0x18d   :  { %v254_v23 = vadd.f32 %v103_v22, %v89_v21 }
 0x18f   :  { %v257_v25 = vrot.slane %v254_v23, 4  ;;  %v111_v26 = vsel %vm110_vm4, %v254_v23, 0.0  ;;  %v128_v27 = vmul.f32 %v254_v23, %v254_v23 }
 0x190   :  { %v112_v28 = vrot.slane %v111_v26, 4 }
 0x191   :  { %v118_v29 = vsel %vm110_vm4, %v257_v25, 0.0  ;;  %v129_v30 = vmul.f32 %v257_v25, %v257_v25  ;;  %v130_v31 = vsel %vm110_vm4, %v128_v27, 0.0 }
 0x192   :  { %v113_v33 = vadd.f32 %v112_v28, %v111_v26  ;;  %v119_v34 = vrot.slane %v118_v29, 4  ;;  %v131_v35 = vrot.slane %v130_v31, 4 }
 0x193   :  { %v137_v36 = vsel %vm110_vm4, %v129_v30, 0.0 }
 0x194   :  { %v114_v37 = vrot.slane %v113_v33, 2  ;;  %v120_v38 = vadd.f32 %v119_v34, %v118_v29  ;;  %v132_v39 = vadd.f32 %v131_v35, %v130_v31  ;;  %v138_v40 = vrot.slane %v137_v36, 4  ;;  %v105_v41 = vpop.f32.mrf.mxu1 }
 0x196   :  { %v115_v43 = vadd.f32 %v114_v37, %v113_v33  ;;  %v121_v44 = vrot.slane %v120_v38, 2  ;;  %v133_v45 = vrot.slane %v132_v39, 2  ;;  %v139_v46 = vadd.f32 %v138_v40, %v137_v36 }
 0x198   :  { %v116_v47 = vrot.slane %v115_v43, 1  ;;  %v122_v48 = vadd.f32 %v121_v44, %v120_v38  ;;  %v134_v49 = vadd.f32 %v133_v45, %v132_v39  ;;  %v140_v50 = vrot.slane %v139_v46, 2 }
 0x19a   :  { %v117_v52 = vadd.f32 %v116_v47, %v115_v43  ;;  %v123_v53 = vrot.slane %v122_v48, 1  ;;  %v135_v54 = vrot.slane %v134_v49, 1  ;;  %v141_v55 = vadd.f32 %v140_v50, %v139_v46 }
 0x19c   :  { %v124_v56 = vadd.f32 %v123_v53, %v122_v48  ;;  %v136_v57 = vadd.f32 %v135_v54, %v134_v49  ;;  %v142_v58 = vrot.slane %v141_v55, 1  ;;  %v125_v59 = vsel %vm91_vm3, %v117_v52, 0.0 }
 0x19e   :  { %v126_v60 = vsel %vm91_vm3, %v124_v56, 0.0  ;;  %v143_v61 = vadd.f32 %v142_v58, %v141_v55  ;;  %v144_v0 = vsel %vm91_vm3, %v136_v57, 0.0 }
 0x19f   :  { %v127_v63 = vadd.f32 %v126_v60, %v125_v59 }
 0x1a0   :  { %v145_v1 = vsel %vm91_vm3, %v143_v61, 0.0 }
 0x1a1   :  { %v146_v2 = vadd.f32 %v145_v1, %v144_v0  ;;  %v154_v3 = vmul.f32 %v153_v62, %v127_v63 }
 0x1a3   :  { %v155_v4 = vmul.f32 %v153_v62, %v146_v2  ;;  %v156_v5 = vmul.f32 %v154_v3, %v154_v3 }
 0x1a5   :  { %v157_v6 = vsub.f32 %v155_v4, %v156_v5 }
 0x1a7   :  { %v158_v7 = vmax.f32 %v157_v6, 0.0 }
 0x1a9   :  { %v160_v8 = vadd.f32 1e-05, %v158_v7 }
 0x1ab   :  { %207 = vrsqrt.f32 %v160_v8  ;;  %vm167_vm7 = vweird.f32 %v160_v8 }
 0x1b1   :  { %v208_v9 = vpop.eup %207 }
 0x1b2   :  { %v162_v10 = vmul.f32 %v208_v9, %v160_v8  ;;  %vm168_vm6 = vweird.f32 %v208_v9 }
 0x1b3   :  { %vm169_vm8 = vmor %vm167_vm7, %vm168_vm6 }
 0x1b4   :  { %v163_v11 = vmul.f32 %v208_v9, %v162_v10 }
 0x1b6   :  { %v164_v12 = vmul.f32 0.5, %v163_v11 }
 0x1b8   :  { %v165_v13 = vsub.f32 1.5, %v164_v12 }
 0x1ba   :  { %v166_v15 = vmul.f32 %v208_v9, %v165_v13 }
 0x1bc   :  { %v170_v16 = vsel %vm169_vm8, %v208_v9, %v166_v15 }
 0x1bd   :  { %v171_v17 = vmul.f32 %v170_v16, %v159_v14 }
 0x1bf   :  { %v173_v19 = vmul.f32 %v171_v17, %v154_v3  ;;  %v176_v20 = vperm.slane %v171_v17, 0 }
 0x1c1   :  { %v174_v21 = vsub.f32 %v172_v18, %v173_v19  ;;  %v178_v22 = vmul.f32 %v176_v20, %v254_v23  ;;  %v179_v24 = vmul.f32 %v176_v20, %v257_v25 }
 0x1c3   :  { %v181_v26 = vperm.slane %v174_v21, 0 }
 0x1c5   :  { %v183_v27 = vadd.f32 %v181_v26, %v178_v22  ;;  %v184_v28 = vadd.f32 %v181_v26, %v179_v24 }
 0x1c7   :  { %v185_v29 = vmax.f32 %v183_v27, 0.0  ;;  %v186_v30 = vmax.f32 %v184_v28, 0.0 }
 0x1c9   :  { %v187_v31 = vpack.c.bf16 %v185_v29, %v185_v29  ;;  %v188_v32 = vpack.c.bf16 %v186_v30, %v186_v30 }
 0x1cb   :  { %190 = vst.msk [vmem:[%s288_s5] sm:$0x3] %vm189_vm9, %v187_v31 }
 0x1cc   :  { %191 = vst.msk [vmem:[%s288_s5 + $0x2] sm:$0x3] %vm189_vm9, %v188_v32 }

// kernel: fcn_n_forward.7
= control target key start
LH: loop header
LB: loop body
LE: loop exit
PB: predicated region body
PF: predicated region fallthrough
CT: control target
= control target key end

     0   :  { %vm36_vm0 = vcmask 130048   ;;  %s275_s24 = smov 112   ;;  %vm76_vm1 = vcmask 1042432   ;;  %vm98_vm2 = vcmask 60416   ;;  %vm113_vm3 = vcmask 64512   ;;  %s381_s1 = inlined_call_operand.vmem [shape: bf16[16,24], index: 1, kind: input, shape index: {}]   ;;  %s382_s0 = inlined_call_operand.vmem [shape: bf16[2,4,16], index: 0, kind: input, shape index: {}]   ;;  %s383_s2 = inlined_call_operand.vmem [shape: f32[1,8], index: 2, kind: input, shape index: {}]   ;;  %s384_s3 = inlined_call_operand.vmem [shape: f32[1,8], index: 3, kind: input, shape index: {}]   ;;  %s385_s5 = inlined_call_operand.vmem [shape: bf16[2,4,8], index: 5, kind: output, shape index: {1}]   ;;  %s386_s4 = inlined_call_operand.vmem [shape: bf16[2,4,8], index: 4, kind: output, shape index: {0}]  }
   0x1   :  { %v266_v0 = vld [vmem:[%s381_s1] sm:$0xff]  ;;  %vm79_vm4 = vcmask 126016   ;;  %v277_v63 = vmov 14.0   ;;  %vm94_vm5 = vcmask 130112   ;;  %s278_s1 = smov 120   ;;  %vm240_vm10 = vcmask 58368  }
   0x2   :  { %v20_v1 = vld [vmem:[%s382_s0] sm:$0x3]  ;;  %v21_v2 = vld [vmem:[%s382_s0 + $0x2] sm:$0x3]  ;;  %46 = vmatpush.bf16.msra.mxu0 %v266_v0  ;;  %s276_s0 = smov 8   ;;  %271 = vrcp.f32 %v277_v63  ;;  %vm225_vm11 = vcmask 1041408  }
   0x3   :  { %25 = vst [vmem:[#allocation1] ss:$4 sm:$0xff] %v20_v1 }
   0x4   :  { %28 = vst [vmem:[#allocation1 + $0x1] ss:$4 sm:$0xff] %v21_v2 }
   0xb   :  { %v29_v3 = vld.sshfl [vmem:[#allocation1] sm:$0xff pattern:$0x73625140] }
   0xc   :  { %265 = vmatmul.msk.bf16.vlgmr.msra.gmra.mxu0 %vm36_vm0, %v29_v3 }
  0x89   :  { %v318_v4 = vpop.f32.mrf.mxu0 }
  0x8a   :  { %v55_v5 = vrot.slane %v318_v4, 7  ;;  %v322_v6 = vrot.slane %v318_v4, 4  ;;  %v80_v56 = vsel %vm79_vm4, %v318_v4, 0.0  ;;  %v122_v59 = vmul.f32 %v318_v4, %v318_v4 }
  0x8b   :  { %v81_v60 = vrot.slane %v80_v56, 4 }
  0x8c   :  { %57 = vrot.lane.b32.xlu0 %v55_v5, %s275_s24  ;;  %v56_v8 = vrot.slane %v322_v6, 7  ;;  %v87_v55 = vsel %vm79_vm4, %v322_v6, 0.0  ;;  %v123_v57 = vmul.f32 %v322_v6, %v322_v6  ;;  %v124_v0 = vsel %vm79_vm4, %v122_v59, 0.0 }
  0x8d   :  { %v88_v58 = vrot.slane %v87_v55, 4  ;;  %v82_v1 = vadd.f32 %v81_v60, %v80_v56  ;;  %v125_v5 = vrot.slane %v124_v0, 4 }
  0x8e   :  { %v131_v61 = vsel %vm79_vm4, %v123_v57, 0.0 }
  0x8f   :  { %v89_v62 = vadd.f32 %v88_v58, %v87_v55  ;;  %v132_v2 = vrot.slane %v131_v61, 4  ;;  %v177_v55 = vld [vmem:[%s383_s2] sm:$0x1] }
  0x91   :  { %v50_v7 = vpop.f32.mrf.mxu0  ;;  %v90_v3 = vrot.slane %v89_v62, 2 }
  0x92   :  { %v83_v7 = vrot.slane %v82_v1, 2 }
  0x94   :  { %59 = vrot.lane.b32.xlu0 %v56_v8, %s275_s24  ;;  %v133_v8 = vadd.f32 %v132_v2, %v131_v61  ;;  %v194_v61 = vld [vmem:[%s384_s3] sm:$0x1] }
  0xfe   :  { %v58_v9 = vpop.permute.xlu0 %57 }
  0xff   :  { %v63_v10 = vadd.f32 %v58_v9, %v318_v4  ;;  %v272_v9 = vpop.eup %271 }
 0x100   :  { %vm170_vm6 = vweird.f32 %v272_v9 }
 0x101   :  { %67 = vst [vmem:[#allocation1] ss:$2 sm:$0xff] %v63_v10  ;;  %v91_v10 = vadd.f32 %v90_v3, %v89_v62 }
 0x106   :  { %v60_v11 = vpop.permute.xlu0 %59 }
 0x107   :  { %v64_v12 = vadd.f32 %v60_v11, %v322_v6  ;;  %v126_v11 = vadd.f32 %v125_v5, %v124_v0 }
 0x108   :  { %v68_v13 = vld.sshfl [vmem:[#allocation1] sm:$0xff pattern:$0x75316420] }
 0x109   :  { %70 = vst [vmem:[#allocation1 + $0x10] ss:$2 sm:$0xff] %v64_v12  ;;  %v72_v14 = vrot.slane %v68_v13, 1  ;;  %v84_v12 = vadd.f32 %v83_v7, %v82_v1  ;;  %v166_v13 = vmul.f32 14.0, %v272_v9 }
 0x10b   :  { %v327_v15 = vsel %vm76_vm1, %v72_v14, 0.0  ;;  %v134_v14 = vrot.slane %v133_v8, 2 }
 0x10c   :  { %v99_v16 = vsel %vm98_vm2, %v327_v15, 0.0  ;;  %v141_v17 = vmul.f32 %v327_v15, %v327_v15 }
 0x10d   :  { %v100_v18 = vrot.slane %v99_v16, 4 }
 0x10e   :  { %v143_v19 = vsel %vm98_vm2, %v141_v17, 0.0  ;;  %v127_v17 = vrot.slane %v126_v11, 2 }
 0x10f   :  { %v101_v20 = vadd.f32 %v100_v18, %v99_v16  ;;  %v144_v24 = vrot.slane %v143_v19, 4  ;;  %v92_v16 = vrot.slane %v91_v10, 1  ;;  %v85_v18 = vrot.slane %v84_v12, 1 }
 0x110   :  { %v71_v21 = vld.sshfl [vmem:[#allocation1 + $0x10] sm:$0xff pattern:$0x75316420] }
 0x111   :  { %v73_v22 = vrot.slane %v71_v21, 1  ;;  %v102_v23 = vrot.slane %v101_v20, 2  ;;  %v145_v30 = vadd.f32 %v144_v24, %v143_v19  ;;  %v167_v19 = vsub.f32 1.0, %v166_v13 }
 0x112   :  { %v93_v21 = vadd.f32 %v92_v16, %v91_v10 }
 0x113   :  { %v334_v25 = vsel %vm76_vm1, %v73_v22, 0.0  ;;  %v103_v28 = vadd.f32 %v102_v23, %v101_v20  ;;  %v146_v36 = vrot.slane %v145_v30, 2  ;;  %v135_v20 = vadd.f32 %v134_v14, %v133_v8 }
 0x114   :  { %v106_v26 = vsel %vm98_vm2, %v334_v25, 0.0  ;;  %v142_v27 = vmul.f32 %v334_v25, %v334_v25  ;;  %v128_v22 = vadd.f32 %v127_v17, %v126_v11  ;;  %v86_v23 = vadd.f32 %v85_v18, %v84_v12 }
 0x115   :  { %v107_v29 = vrot.slane %v106_v26, 4  ;;  %v104_v34 = vrot.slane %v103_v28, 1  ;;  %v147_v42 = vadd.f32 %v146_v36, %v145_v30  ;;  %v168_v24 = vmul.f32 %v272_v9, %v167_v19 }
 0x116   :  { %v150_v31 = vsel %vm98_vm2, %v142_v27, 0.0  ;;  %v96_v27 = vsel %vm94_vm5, %v93_v21, 0.0 }
 0x117   :  { %v108_v32 = vadd.f32 %v107_v29, %v106_v26  ;;  %v151_v33 = vrot.slane %v150_v31, 4  ;;  %v105_v40 = vadd.f32 %v104_v34, %v103_v28  ;;  %v148_v48 = vrot.slane %v147_v42, 1 }
 0x118   :  { %v136_v26 = vrot.slane %v135_v20, 1  ;;  %v129_v28 = vrot.slane %v128_v22, 1  ;;  %v95_v29 = vsel %vm94_vm5, %v86_v23, 0.0  ;;  %v169_v30 = vadd.f32 %v272_v9, %v168_v24 }
 0x119   :  { %v109_v35 = vrot.slane %v108_v32, 2  ;;  %v152_v37 = vadd.f32 %v151_v33, %v150_v31  ;;  %v114_v46 = vsel %vm113_vm3, %v105_v40, 0.0  ;;  %v149_v51 = vadd.f32 %v148_v48, %v147_v42 }
 0x11a   :  { %v97_v33 = vadd.f32 %v96_v27, %v95_v29  ;;  %v130_v34 = vadd.f32 %v129_v28, %v128_v22  ;;  %v171_v36 = vsel %vm170_vm6, %v272_v9, %v169_v30 }
 0x11b   :  { %v110_v38 = vadd.f32 %v109_v35, %v108_v32  ;;  %v153_v39 = vrot.slane %v152_v37, 2  ;;  %v157_v53 = vsel %vm113_vm3, %v149_v51, 0.0  ;;  %v137_v32 = vadd.f32 %v136_v26, %v135_v20 }
 0x11d   :  { %v111_v41 = vrot.slane %v110_v38, 1  ;;  %v154_v43 = vadd.f32 %v153_v39, %v152_v37  ;;  %v139_v37 = vsel %vm94_vm5, %v137_v32, 0.0 }
 0x11f   :  { %v112_v44 = vadd.f32 %v111_v41, %v110_v38  ;;  %v155_v45 = vrot.slane %v154_v43, 1  ;;  %v138_v38 = vsel %vm94_vm5, %v130_v34, 0.0 }
 0x120   :  { %v140_v40 = vadd.f32 %v139_v37, %v138_v38 }
 0x121   :  { %v115_v47 = vsel %vm113_vm3, %v112_v44, 0.0  ;;  %v156_v50 = vadd.f32 %v155_v45, %v154_v43 }
 0x122   :  { %v116_v49 = vadd.f32 %v115_v47, %v114_v46 }
 0x123   :  { %v158_v52 = vsel %vm113_vm3, %v156_v50, 0.0 }
 0x124   :  { %118 = vrot.lane.b32.xlu1 %v116_v49, %s276_s0  ;;  %v159_v54 = vadd.f32 %v158_v52, %v157_v53 }
 0x12c   :  { %161 = vrot.lane.b32.xlu1 %v159_v54, %s276_s0 }
 0x196   :  { %v119_v31 = vpop.permute.xlu1 %118 }
 0x197   :  { %v121_v35 = vadd.f32 %v119_v31, %v97_v33 }
 0x199   :  { %v172_v39 = vmul.f32 %v171_v36, %v121_v35 }
 0x19b   :  { %v174_v43 = vmul.f32 %v172_v39, %v172_v39 }
 0x19e   :  { %v162_v41 = vpop.permute.xlu1 %161 }
 0x19f   :  { %v164_v42 = vadd.f32 %v162_v41, %v140_v40 }
 0x1a1   :  { %v173_v44 = vmul.f32 %v171_v36, %v164_v42 }
 0x1a3   :  { %v175_v45 = vsub.f32 %v173_v44, %v174_v43 }
 0x1a5   :  { %v176_v46 = vmax.f32 %v175_v45, 0.0 }
 0x1a7   :  { %v178_v47 = vadd.f32 1e-05, %v176_v46 }
 0x1a9   :  { %273 = vrsqrt.f32 %v178_v47  ;;  %vm185_vm8 = vweird.f32 %v178_v47 }
 0x1af   :  { %v274_v48 = vpop.eup %273 }
 0x1b0   :  { %v180_v49 = vmul.f32 %v274_v48, %v178_v47  ;;  %vm186_vm7 = vweird.f32 %v274_v48 }
 0x1b1   :  { %vm187_vm9 = vmor %vm185_vm8, %vm186_vm7 }
 0x1b2   :  { %v181_v50 = vmul.f32 %v274_v48, %v180_v49 }
 0x1b4   :  { %v182_v51 = vmul.f32 0.5, %v181_v50 }
 0x1b6   :  { %v183_v52 = vsub.f32 1.5, %v182_v51 }
 0x1b8   :  { %v184_v53 = vmul.f32 %v274_v48, %v183_v52 }
 0x1ba   :  { %v188_v54 = vsel %vm187_vm9, %v274_v48, %v184_v53 }
 0x1bb   :  { %190 = vrot.lane.b32.xlu2 %v188_v54, %s278_s1 }
 0x215   :  { %v191_v56 = vpop.permute.xlu2 %190 }
 0x216   :  { %v193_v57 = vmul.f32 %v191_v56, %v177_v55 }
 0x218   :  { %v196_v58 = vperm.slane %v193_v57, 0 }
 0x21a   :  { %197 = vrot.lane.b32.xlu2 %v196_v58, %s276_s0  ;;  %v243_v0 = vmul.f32 %v196_v58, %v327_v15  ;;  %v244_v1 = vmul.f32 %v196_v58, %v334_v25 }
 0x274   :  { %v198_v59 = vpop.permute.xlu2 %197 }
 0x275   :  { %v200_v60 = vmul.f32 %v198_v59, %v172_v39  ;;  %v207_v15 = vmul.f32 %v198_v59, %v318_v4  ;;  %v208_v25 = vmul.f32 %v198_v59, %v322_v6 }
 0x277   :  { %202 = vrot.lane.b32.xlu0 %v200_v60, %s278_s1 }
 0x2e9   :  { %v203_v62 = vpop.permute.xlu0 %202 }
 0x2ea   :  { %v205_v63 = vsub.f32 %v194_v61, %v203_v62 }
 0x2ec   :  { %v210_v2 = vperm.slane %v205_v63, 0 }
 0x2ee   :  { %v245_v3 = vadd.f32 %v243_v0, %v210_v2  ;;  %v246_v5 = vadd.f32 %v244_v1, %v210_v2  ;;  %212 = vrot.lane.b32.xlu1 %v210_v2, %s276_s0 }
 0x2f0   :  { %v247_v7 = vmax.f32 %v245_v3, 0.0  ;;  %v248_v8 = vmax.f32 %v246_v5, 0.0 }
 0x2f2   :  { %v249_v9 = vpack.c.bf16 %v247_v7, %v247_v7  ;;  %v250_v10 = vpack.c.bf16 %v248_v8, %v248_v8 }
 0x2f4   :  { %251 = vst.msk [vmem:[%s385_s5] sm:$0x3] %vm240_vm10, %v249_v9 }
 0x2f5   :  { %252 = vst.msk [vmem:[%s385_s5 + $0x2] sm:$0x3] %vm240_vm10, %v250_v10 }
 0x360   :  { %v213_v11 = vpop.permute.xlu1 %212 }
 0x361   :  { %v215_v12 = vadd.f32 %v213_v11, %v207_v15  ;;  %v216_v13 = vadd.f32 %v213_v11, %v208_v25 }
 0x363   :  { %v217_v14 = vmax.f32 %v215_v12, 0.0  ;;  %v218_v16 = vmax.f32 %v216_v13, 0.0 }
 0x365   :  { %v219_v17 = vpack.c.bf16 %v217_v14, %v217_v14  ;;  %v220_v18 = vpack.c.bf16 %v218_v16, %v218_v16 }
 0x367   :  { %v223_v19 = vrot.slane %v219_v17, 2  ;;  %v224_v20 = vrot.slane %v220_v18, 2 }
 0x369   :  { %v232_v21 = vsel %vm225_vm11, %v220_v18, %v224_v20  ;;  %v228_v22 = vsel %vm225_vm11, %v219_v17, %v223_v19 }
 0x36a   :  { %236 = vrot.lane.b32.xlu0 %v232_v21, %s278_s1  ;;  %234 = vrot.lane.b32.xlu2 %v228_v22, %s278_s1 }
 0x3c4   :  { %v235_v23 = vpop.permute.xlu2 %234 }
 0x3c5   :  { %241 = vst.msk [vmem:[%s386_s4] sm:$0x3] %vm240_vm10, %v235_v23 }
 0x3dc   :  { %v237_v4 = vpop.permute.xlu0 %236 }
 0x3dd   :  { %242 = vst.msk [vmem:[%s386_s4 + $0x2] sm:$0x3] %vm240_vm10, %v237_v4 }

// kernel: fcn_n_forward.5
= control target key start
LH: loop header
LB: loop body
LE: loop exit
PB: predicated region body
PF: predicated region fallthrough
CT: control target
= control target key end

     0   :  { %vm69_vm0 = vcmask 1043456   ;;  %vm38_vm1 = vcmask 1041408   ;;  %vm65_vm2 = vcmask 64512   ;;  %s180_s26 = smov 124   ;;  %vm34_vm3 = vcmask 31744   ;;  %s251_s0 = inlined_call_operand.vmem [shape: f32[2,8,8], index: 0, kind: input, shape index: {}]   ;;  %s252_s1 = inlined_call_operand.vmem [shape: bf16[8,8], index: 1, kind: input, shape index: {}]   ;;  %s253_s2 = inlined_call_operand.vmem [shape: bf16[4,8], index: 2, kind: input, shape index: {}]   ;;  %s254_s3 = inlined_call_operand.vmem [shape: f32[1,8], index: 3, kind: input, shape index: {}]   ;;  %s255_s4 = inlined_call_operand.vmem [shape: f32[1,8], index: 4, kind: input, shape index: {}]   ;;  %s256_s5 = inlined_call_operand.vmem [shape: bf16[2,8,8], index: 5, kind: output, shape index: {}]  }
   0x1   :  { %v21_v0 = vld [vmem:[%s251_s0] sm:$0xff]  ;;  %v22_v1 = vld [vmem:[%s251_s0 + $0x8] sm:$0xff]  ;;  %v181_v15 = vmov 16.0   ;;  %vm165_vm8 = vcmask 60416  }
   0x2   :  { %v25_v2 = vld [vmem:[%s252_s1] sm:$0xf]  ;;  %v23_v3 = vpack.c.bf16 %v21_v0, %v21_v0  ;;  %v24_v4 = vpack.c.bf16 %v22_v1, %v22_v1  ;;  %176 = vrcp.f32 %v181_v15 }
   0x3   :  { %v71_v5 = vsel %vm69_vm0, %v25_v2, 0  ;;  %v26_v6 = vld [vmem:[%s253_s2] sm:$0x3] }
   0x4   :  { %80 = vmatpush.bf16.msra.mxu1 %v71_v5  ;;  %v40_v7 = vsel %vm38_vm1, %v26_v6, 0  ;;  %v29_v8 = vunpack.c.l.b16 %v23_v3  ;;  %v30_v9 = vunpack.c.l.b16 %v24_v4 }
   0x5   :  { %49 = vmatpush.bf16.msra.mxu0 %v40_v7 }
   0x6   :  { %v31_v10 = vpack.c.b16 %v30_v9, %v29_v8 }
   0x8   :  { %32 = vrot.lane.b32.xlu0 %v31_v10, %s180_s26  ;;  %173 = vmatmul.msk.bf16.vlgmr.msra.gmra.mxu1 %vm65_vm2, %v31_v10  ;;  %v177_v20 = vpop.eup %176  ;;  %v135_v10 = vld [vmem:[%s254_s3] sm:$0x1] }
   0x9   :  { %v124_v29 = vmul.f32 16.0, %v177_v20  ;;  %vm128_vm4 = vweird.f32 %v177_v20 }
   0xb   :  { %v125_v36 = vsub.f32 1.0, %v124_v29 }
   0xd   :  { %v126_v44 = vmul.f32 %v177_v20, %v125_v36 }
   0xf   :  { %v127_v51 = vadd.f32 %v177_v20, %v126_v44 }
  0x11   :  { %v129_v58 = vsel %vm128_vm4, %v177_v20, %v127_v51 }
  0x7a   :  { %v33_v11 = vpop.permute.xlu0 %32 }
  0x7b   :  { %172 = vmatmul.msk.bf16.vlgmr.msra.gmra.mxu0 %vm34_vm3, %v33_v11 }
  0x85   :  { %v82_v12 = vpop.f32.mrf.mxu1 }
  0x8d   :  { %v84_v28 = vpop.f32.mrf.mxu1 }
  0xf8   :  { %v51_v13 = vpop.f32.mrf.mxu0 }
  0xf9   :  { %v58_v14 = vrot.slane %v51_v13, 7 }
  0xfb   :  { %v225_v16 = vadd.f32 %v82_v12, %v58_v14  ;;  %v148_v14 = vld [vmem:[%s255_s4] sm:$0x1] }
  0xfd   :  { %v87_v17 = vsel %vm65_vm2, %v225_v16, 0.0  ;;  %v104_v18 = vmul.f32 %v225_v16, %v225_v16 }
  0xfe   :  { %v88_v19 = vrot.slane %v87_v17, 4 }
  0xff   :  { %v106_v21 = vsel %vm65_vm2, %v104_v18, 0.0 }
 0x100   :  { %v89_v22 = vadd.f32 %v88_v19, %v87_v17  ;;  %v107_v23 = vrot.slane %v106_v21, 4  ;;  %v53_v24 = vpop.f32.mrf.mxu0 }
 0x101   :  { %v59_v25 = vrot.slane %v53_v24, 7 }
 0x102   :  { %v90_v26 = vrot.slane %v89_v22, 2  ;;  %v108_v27 = vadd.f32 %v107_v23, %v106_v21 }
 0x103   :  { %v85_v30 = vadd.f32 %v84_v28, %v59_v25 }
 0x104   :  { %v109_v31 = vrot.slane %v108_v27, 2  ;;  %v91_v34 = vadd.f32 %v90_v26, %v89_v22 }
 0x105   :  { %v94_v32 = vsel %vm65_vm2, %v85_v30, 0.0  ;;  %v105_v33 = vmul.f32 %v85_v30, %v85_v30 }
 0x106   :  { %v95_v35 = vrot.slane %v94_v32, 4  ;;  %v110_v38 = vadd.f32 %v109_v31, %v108_v27  ;;  %v92_v41 = vrot.slane %v91_v34, 1 }
 0x107   :  { %v113_v37 = vsel %vm65_vm2, %v105_v33, 0.0 }
 0x108   :  { %v96_v39 = vadd.f32 %v95_v35, %v94_v32  ;;  %v114_v40 = vrot.slane %v113_v37, 4  ;;  %v111_v45 = vrot.slane %v110_v38, 1  ;;  %v93_v48 = vadd.f32 %v92_v41, %v91_v34 }
 0x10a   :  { %v97_v42 = vrot.slane %v96_v39, 2  ;;  %v115_v43 = vadd.f32 %v114_v40, %v113_v37  ;;  %v112_v52 = vadd.f32 %v111_v45, %v110_v38  ;;  %v101_v55 = vsel %vm65_vm2, %v93_v48, 0.0 }
 0x10c   :  { %v98_v46 = vadd.f32 %v97_v42, %v96_v39  ;;  %v116_v47 = vrot.slane %v115_v43, 2  ;;  %v120_v60 = vsel %vm65_vm2, %v112_v52, 0.0 }
 0x10e   :  { %v99_v49 = vrot.slane %v98_v46, 1  ;;  %v117_v50 = vadd.f32 %v116_v47, %v115_v43 }
 0x110   :  { %v100_v53 = vadd.f32 %v99_v49, %v98_v46  ;;  %v118_v54 = vrot.slane %v117_v50, 1 }
 0x112   :  { %v102_v56 = vsel %vm65_vm2, %v100_v53, 0.0  ;;  %v119_v57 = vadd.f32 %v118_v54, %v117_v50 }
 0x113   :  { %v103_v59 = vadd.f32 %v102_v56, %v101_v55 }
 0x114   :  { %v121_v61 = vsel %vm65_vm2, %v119_v57, 0.0 }
 0x115   :  { %v122_v62 = vadd.f32 %v121_v61, %v120_v60  ;;  %v130_v63 = vmul.f32 %v129_v58, %v103_v59 }
 0x117   :  { %v131_v0 = vmul.f32 %v129_v58, %v122_v62  ;;  %v132_v1 = vmul.f32 %v130_v63, %v130_v63 }
 0x119   :  { %v133_v2 = vsub.f32 %v131_v0, %v132_v1 }
 0x11b   :  { %v134_v3 = vmax.f32 %v133_v2, 0.0 }
 0x11d   :  { %v136_v4 = vadd.f32 1e-05, %v134_v3 }
 0x11f   :  { %178 = vrsqrt.f32 %v136_v4  ;;  %vm143_vm6 = vweird.f32 %v136_v4 }
 0x125   :  { %v179_v5 = vpop.eup %178 }
 0x126   :  { %v138_v6 = vmul.f32 %v179_v5, %v136_v4  ;;  %vm144_vm5 = vweird.f32 %v179_v5 }
 0x127   :  { %vm145_vm7 = vmor %vm143_vm6, %vm144_vm5 }
 0x128   :  { %v139_v7 = vmul.f32 %v179_v5, %v138_v6 }
 0x12a   :  { %v140_v8 = vmul.f32 0.5, %v139_v7 }
 0x12c   :  { %v141_v9 = vsub.f32 1.5, %v140_v8 }
 0x12e   :  { %v142_v11 = vmul.f32 %v179_v5, %v141_v9 }
 0x130   :  { %v146_v12 = vsel %vm145_vm7, %v179_v5, %v142_v11 }
 0x131   :  { %v147_v13 = vmul.f32 %v146_v12, %v135_v10 }
 0x133   :  { %v149_v15 = vmul.f32 %v147_v13, %v130_v63  ;;  %v152_v17 = vperm.slane %v147_v13, 0 }
 0x135   :  { %v150_v18 = vsub.f32 %v148_v14, %v149_v15  ;;  %v154_v19 = vmul.f32 %v152_v17, %v225_v16  ;;  %v155_v20 = vmul.f32 %v152_v17, %v85_v30 }
 0x137   :  { %v157_v21 = vperm.slane %v150_v18, 0 }
 0x139   :  { %v159_v22 = vadd.f32 %v157_v21, %v154_v19  ;;  %v160_v23 = vadd.f32 %v157_v21, %v155_v20 }
 0x13b   :  { %v161_v24 = vmax.f32 %v159_v22, 0.0  ;;  %v162_v25 = vmax.f32 %v160_v23, 0.0 }
 0x13d   :  { %v163_v26 = vpack.c.bf16 %v161_v24, %v161_v24  ;;  %v164_v27 = vpack.c.bf16 %v162_v25, %v162_v25 }
 0x13f   :  { %166 = vst.msk [vmem:[%s256_s5] sm:$0xf] %vm165_vm8, %v163_v26 }
 0x140   :  { %167 = vst.msk [vmem:[%s256_s5 + $0x4] sm:$0xf] %vm165_vm8, %v164_v27 }

// kernel: fcn_n_forward.8
= control target key start
LH: loop header
LB: loop body
LE: loop exit
PB: predicated region body
PF: predicated region fallthrough
CT: control target
= control target key end

     0   :  { %vm102_vm0 = vcmask 1043456   ;;  %vm27_vm1 = vcmask 1040384   ;;  %vm40_vm2 = vcmask 1043459   ;;  %vm32_vm3 = vcmask 1041409   ;;  %s623_s24 = smov 124   ;;  %s870_s1 = inlined_call_operand.vmem [shape: bf16[8,12], index: 1, kind: input, shape index: {}]   ;;  %s871_s0 = inlined_call_operand.vmem [shape: bf16[2,7,8], index: 0, kind: input, shape index: {}]   ;;  %s872_s2 = inlined_call_operand.vmem [shape: f32[1,4], index: 2, kind: input, shape index: {}]   ;;  %s873_s3 = inlined_call_operand.vmem [shape: f32[1,4], index: 3, kind: input, shape index: {}]   ;;  %s874_s5 = inlined_call_operand.vmem [shape: bf16[2,7,4], index: 5, kind: output, shape index: {1}]   ;;  %s875_s4 = inlined_call_operand.vmem [shape: bf16[2,7,4], index: 4, kind: output, shape index: {0}]  }
   0x1   :  { %v22_v0 = vld [vmem:[%s870_s1] sm:$0xf]  ;;  %v21_v2 = vld [vmem:[%s871_s0 + $0x4] sm:$0xf]  ;;  %vm36_vm4 = vcmask 1042434   ;;  %vm99_vm5 = vcmask 64512  }
   0x2   :  { %v20_v1 = vld [vmem:[%s871_s0] sm:$0xf]  ;;  %v104_v3 = vsel %vm102_vm0, %v22_v0, 0  ;;  %v26_v5 = vrot.slane %v21_v2, 3  ;;  %s620_s0 = smov 120   ;;  %vm227_vm6 = vcmask 1045504  }
   0x3   :  { %v25_v4 = vrot.slane %v20_v1, 3  ;;  %113 = vmatpush.bf16.msra.mxu0 %v104_v3  ;;  %vm273_vm7 = vcmask 30720   ;;  %vm288_vm8 = vcmask 31744   ;;  %s621_s1 = smov 4   ;;  %vm254_vm9 = vcmask 63520  }
   0x4   :  { %v46_v13 = vsel %vm27_vm1, %v21_v2, %v26_v5  ;;  %v48_v14 = vsel %vm32_vm3, %v21_v2, %v26_v5  ;;  %v51_v15 = vsel %vm36_vm4, %v21_v2, %v26_v5  ;;  %v54_v16 = vsel %vm40_vm2, %v21_v2, %v26_v5 }
   0x5   :  { %v30_v6 = vsel %vm27_vm1, %v20_v1, %v25_v4  ;;  %v33_v7 = vsel %vm32_vm3, %v20_v1, %v25_v4  ;;  %v37_v8 = vsel %vm36_vm4, %v20_v1, %v25_v4  ;;  %v41_v9 = vsel %vm40_vm2, %v20_v1, %v25_v4 }
   0x6   :  { %v35_v10 = vrot.slane %v33_v7, 1  ;;  %v39_v11 = vrot.slane %v37_v8, 2  ;;  %v43_v12 = vrot.slane %v41_v9, 3  ;;  %79 = vst [vmem:[#allocation1] ss:$9 sm:$0xff] %v30_v6  ;;  %v65_v17 = vunpack.i.h.s16 %v46_v13 }
   0x7   :  { %v50_v18 = vrot.slane %v48_v14, 1  ;;  %v53_v19 = vrot.slane %v51_v15, 2  ;;  %v56_v20 = vrot.slane %v54_v16, 3  ;;  %vm269_vm10 = vcmask 64544  }
   0x8   :  { %v607_v21 = vpack.i.b16 %v46_v13, %v43_v12  ;;  %82 = vst [vmem:[#allocation1 + $0x1] ss:$9 sm:$0xff] %v35_v10  ;;  %vm576_vm15 = vcmask 27648   ;;  %vm577_vm0 = vsmask.f32 3328 }
   0x9   :  { %85 = vst [vmem:[#allocation1 + $0x2] ss:$9 sm:$0xff] %v39_v11  ;;  %v67_v22 = vunpack.i.h.s16 %v50_v18  ;;  %v69_v23 = vunpack.i.h.s16 %v53_v19  ;;  %v608_v24 = vpack.i.b16 %v50_v18, %v65_v17  ;;  %vm812_vm1 = vmand %vm576_vm15, %vm577_vm0 }
   0xa   :  { %88 = vst [vmem:[#allocation1 + $0x3] ss:$9 sm:$0xff] %v607_v21 }
   0xb   :  { %v609_v25 = vpack.i.b16 %v53_v19, %v67_v22  ;;  %v610_v26 = vpack.i.b16 %v56_v20, %v69_v23  ;;  %91 = vst [vmem:[#allocation1 + $0x4] ss:$9 sm:$0xff] %v608_v24 }
   0xd   :  { %94 = vst [vmem:[#allocation1 + $0x5] ss:$9 sm:$0xff] %v609_v25 }
   0xe   :  { %97 = vst [vmem:[#allocation1 + $0x6] ss:$9 sm:$0xff] %v610_v26 }
  0x15   :  { %v98_v27 = vld [vmem:[#allocation1] sm:$0xff] }
  0x16   :  { %611 = vmatmul.msk.bf16.vlgmr.msra.gmra.mxu0 %vm99_vm5, %v98_v27 }
  0x93   :  { %v665_v28 = vpop.f32.mrf.mxu0 }
  0x94   :  { %146 = vrot.lane.b32.xlu0 %v665_v28, %s620_s0  ;;  %v669_v29 = vrot.slane %v665_v28, 4  ;;  %v672_v30 = vrot.slane %v665_v28, 2  ;;  %v677_v31 = vrot.slane %v665_v28, 1  ;;  %v681_v32 = vrot.slane %v665_v28, 5 }
  0x95   :  { %v684_v33 = vrot.slane %v665_v28, 3  ;;  %v691_v35 = vrot.slane %v665_v28, 7  ;;  %v713_v42 = vrot.slane %v665_v28, 6 }
  0x96   :  { %154 = vrot.lane.b32.xlu2 %v669_v29, %s620_s0  ;;  %150 = vrot.lane.b32.xlu1 %v672_v30, %s620_s0 }
  0x9b   :  { %v688_v34 = vpop.f32.mrf.mxu0 }
  0x9c   :  { %148 = vrot.lane.b32.xlu0 %v677_v31, %s620_s0  ;;  %v695_v36 = vrot.slane %v688_v34, 1  ;;  %v700_v37 = vrot.slane %v688_v34, 2  ;;  %v704_v38 = vrot.slane %v688_v34, 3  ;;  %v707_v39 = vrot.slane %v688_v34, 4 }
  0x9d   :  { %v721_v56 = vrot.slane %v688_v34, 5 }
  0x9e   :  { %156 = vrot.lane.b32.xlu2 %v681_v32, %s620_s0  ;;  %152 = vrot.lane.b32.xlu1 %v684_v33, %s620_s0 }
  0xa4   :  { %158 = vrot.lane.b32.xlu0 %v691_v35, %s620_s0 }
  0xa6   :  { %160 = vrot.lane.b32.xlu1 %v688_v34, %s620_s0  ;;  %162 = vrot.lane.b32.xlu2 %v695_v36, %s620_s0 }
  0xac   :  { %164 = vrot.lane.b32.xlu0 %v700_v37, %s620_s0 }
  0xae   :  { %166 = vrot.lane.b32.xlu1 %v704_v38, %s620_s0  ;;  %168 = vrot.lane.b32.xlu2 %v707_v39, %s620_s0 }
  0xf0   :  { %v155_v40 = vpop.permute.xlu2 %154 }
  0xf1   :  { %v186_v41 = vadd.f32 %v155_v40, %v681_v32 }
  0xf3   :  { %214 = vst [vmem:[#allocation1 + $0x4] ss:$9 sm:$0xff] %v186_v41 }
  0xf8   :  { %v157_v43 = vpop.permute.xlu2 %156 }
  0xf9   :  { %v187_v44 = vadd.f32 %v157_v43, %v713_v42 }
  0xfb   :  { %216 = vst [vmem:[#allocation1 + $0x5] ss:$9 sm:$0xff] %v187_v44 }
 0x100   :  { %v163_v49 = vpop.permute.xlu2 %162 }
 0x101   :  { %v190_v58 = vadd.f32 %v163_v49, %v700_v37 }
 0x106   :  { %v147_v45 = vpop.permute.xlu0 %146 }
 0x107   :  { %v182_v46 = vadd.f32 %v147_v45, %v677_v31 }
 0x108   :  { %v151_v47 = vpop.permute.xlu1 %150  ;;  %v169_v55 = vpop.permute.xlu2 %168 }
 0x109   :  { %206 = vst [vmem:[#allocation1] ss:$9 sm:$0xff] %v182_v46  ;;  %v184_v48 = vadd.f32 %v151_v47, %v684_v33  ;;  %v193_v59 = vadd.f32 %v169_v55, %v721_v56 }
 0x10b   :  { %210 = vst [vmem:[#allocation1 + $0x2] ss:$9 sm:$0xff] %v184_v48 }
 0x10e   :  { %v149_v50 = vpop.permute.xlu0 %148 }
 0x10f   :  { %v183_v51 = vadd.f32 %v149_v50, %v672_v30 }
 0x110   :  { %v153_v52 = vpop.permute.xlu1 %152 }
 0x111   :  { %208 = vst [vmem:[#allocation1 + $0x1] ss:$9 sm:$0xff] %v183_v51  ;;  %v185_v53 = vadd.f32 %v153_v52, %v669_v29 }
 0x113   :  { %212 = vst [vmem:[#allocation1 + $0x3] ss:$9 sm:$0xff] %v185_v53 }
 0x116   :  { %v159_v54 = vpop.permute.xlu0 %158 }
 0x117   :  { %v188_v62 = vadd.f32 %v159_v54, %v688_v34 }
 0x118   :  { %v161_v57 = vpop.permute.xlu1 %160 }
 0x119   :  { %v189_v61 = vadd.f32 %v161_v57, %v695_v36  ;;  %v297_v57 = vmul.f32 %v665_v28, %v665_v28 }
 0x11a   :  { %v217_v60 = vld [vmem:[#allocation1] sm:$0xff] }
 0x11b   :  { %220 = vst [vmem:[#allocation1 + $0x2] ss:$9 sm:$0xff] %v190_v58  ;;  %v728_v63 = vsel %vm227_vm6, %v217_v60, 0.0  ;;  %v298_v58 = vmul.f32 %v677_v31, %v677_v31  ;;  %v299_v60 = vmul.f32 %v672_v30, %v672_v30 }
 0x11c   :  { %223 = vst [vmem:[#allocation1 + $0x5] ss:$9 sm:$0xff] %v193_v59  ;;  %v366_v0 = vmul.f32 %v728_v63, %v728_v63  ;;  %v274_v2 = vsel %vm273_vm7, %v728_v63, 0.0 }
 0x11d   :  { %218 = vst [vmem:[#allocation1] ss:$9 sm:$0xff] %v188_v62  ;;  %v275_v7 = vrot.slane %v274_v2, 4  ;;  %v301_v62 = vmul.f32 %v669_v29, %v669_v29 }
 0x11e   :  { %219 = vst [vmem:[#allocation1 + $0x1] ss:$9 sm:$0xff] %v189_v61  ;;  %v165_v1 = vpop.permute.xlu0 %164  ;;  %v368_v5 = vsel %vm273_vm7, %v366_v0, 0.0  ;;  %v300_v61 = vmul.f32 %v684_v33, %v684_v33  ;;  %v302_v0 = vmul.f32 %v681_v32, %v681_v32 }
 0x11f   :  { %v191_v3 = vadd.f32 %v165_v1, %v704_v38  ;;  %v369_v8 = vrot.slane %v368_v5, 4  ;;  %v276_v9 = vadd.f32 %v275_v7, %v274_v2  ;;  %v303_v1 = vmul.f32 %v713_v42, %v713_v42 }
 0x120   :  { %v167_v4 = vpop.permute.xlu1 %166  ;;  %v308_v2 = vmul.f32 %v704_v38, %v704_v38  ;;  %v307_v7 = vmul.f32 %v700_v37, %v700_v37 }
 0x121   :  { %221 = vst [vmem:[#allocation1 + $0x3] ss:$9 sm:$0xff] %v191_v3  ;;  %v192_v6 = vadd.f32 %v167_v4, %v707_v39  ;;  %v370_v10 = vadd.f32 %v369_v8, %v368_v5  ;;  %v277_v11 = vrot.slane %v276_v9, 2  ;;  %v304_v3 = vmul.f32 %v691_v35, %v691_v35 }
 0x122   :  { %v305_v5 = vmul.f32 %v688_v34, %v688_v34  ;;  %v309_v8 = vmul.f32 %v707_v39, %v707_v39 }
 0x123   :  { %222 = vst [vmem:[#allocation1 + $0x4] ss:$9 sm:$0xff] %v192_v6  ;;  %v371_v14 = vrot.slane %v370_v10, 2  ;;  %v278_v17 = vadd.f32 %v277_v11, %v276_v9  ;;  %v306_v6 = vmul.f32 %v695_v36, %v695_v36  ;;  %v310_v9 = vmul.f32 %v721_v56, %v721_v56 }
 0x125   :  { %v372_v21 = vadd.f32 %v371_v14, %v370_v10  ;;  %v279_v23 = vrot.slane %v278_v17, 1 }
 0x127   :  { %v373_v27 = vrot.slane %v372_v21, 1  ;;  %v280_v41 = vadd.f32 %v279_v23, %v278_v17 }
 0x129   :  { %v374_v46 = vadd.f32 %v373_v27, %v372_v21  ;;  %v289_v49 = vsel %vm288_vm8, %v280_v41, 0.0 }
 0x12a   :  { %v224_v12 = vld [vmem:[#allocation1] sm:$0xff] }
 0x12b   :  { %230 = vst [vmem:[#allocation1] ss:$9 sm:$0xff] %v665_v28  ;;  %v739_v13 = vsel %vm227_vm6, %v224_v12, 0.0  ;;  %v382_v53 = vsel %vm288_vm8, %v374_v46, 0.0 }
 0x12c   :  { %232 = vst [vmem:[#allocation1 + $0x1] ss:$9 sm:$0xff] %v677_v31  ;;  %v281_v15 = vsel %vm273_vm7, %v739_v13, 0.0  ;;  %v367_v16 = vmul.f32 %v739_v13, %v739_v13 }
 0x12d   :  { %234 = vst [vmem:[#allocation1 + $0x2] ss:$9 sm:$0xff] %v672_v30  ;;  %v282_v18 = vrot.slane %v281_v15, 4 }
 0x12e   :  { %236 = vst [vmem:[#allocation1 + $0x3] ss:$9 sm:$0xff] %v684_v33  ;;  %v375_v19 = vsel %vm273_vm7, %v367_v16, 0.0 }
 0x12f   :  { %238 = vst [vmem:[#allocation1 + $0x4] ss:$9 sm:$0xff] %v669_v29  ;;  %v283_v20 = vadd.f32 %v282_v18, %v281_v15  ;;  %v376_v22 = vrot.slane %v375_v19, 4 }
 0x130   :  { %240 = vst [vmem:[#allocation1 + $0x5] ss:$9 sm:$0xff] %v681_v32 }
 0x131   :  { %242 = vst [vmem:[#allocation1 + $0x6] ss:$9 sm:$0xff] %v713_v42  ;;  %v284_v24 = vrot.slane %v283_v20, 2  ;;  %v377_v25 = vadd.f32 %v376_v22, %v375_v19  ;;  %v622_v19 = vmov 26.0  }
 0x132   :  { %616 = vrcp.f32 %v622_v19 }
 0x133   :  { %v285_v26 = vadd.f32 %v284_v24, %v283_v20  ;;  %v378_v40 = vrot.slane %v377_v25, 2 }
 0x135   :  { %v286_v43 = vrot.slane %v285_v26, 1  ;;  %v379_v44 = vadd.f32 %v378_v40, %v377_v25 }
 0x137   :  { %v287_v45 = vadd.f32 %v286_v43, %v285_v26  ;;  %v380_v47 = vrot.slane %v379_v44, 1 }
 0x138   :  { %v243_v48 = vld [vmem:[#allocation1] sm:$0xff]  ;;  %v617_v26 = vpop.eup %616 }
 0x139   :  { %244 = vst [vmem:[#allocation1] ss:$9 sm:$0xff] %v691_v35  ;;  %v290_v50 = vsel %vm288_vm8, %v287_v45, 0.0  ;;  %v381_v51 = vadd.f32 %v380_v47, %v379_v44  ;;  %v255_v12 = vsel %vm254_vm9, %v243_v48, 0.0  ;;  %v391_v43 = vmul.f32 26.0, %v617_v26 }
 0x13a   :  { %245 = vst [vmem:[#allocation1 + $0x1] ss:$9 sm:$0xff] %v688_v34  ;;  %v291_v52 = vadd.f32 %v290_v50, %v289_v49  ;;  %v256_v17 = vrot.slane %v255_v12, 4  ;;  %vm395_vm11 = vweird.f32 %v617_v26 }
 0x13b   :  { %246 = vst [vmem:[#allocation1 + $0x2] ss:$9 sm:$0xff] %v695_v36  ;;  %v383_v54 = vsel %vm288_vm8, %v381_v51, 0.0  ;;  %v392_v48 = vsub.f32 1.0, %v391_v43 }
 0x13c   :  { %247 = vst [vmem:[#allocation1 + $0x3] ss:$9 sm:$0xff] %v700_v37  ;;  %293 = vrot.lane.b32.xlu0 %v291_v52, %s621_s1  ;;  %v384_v55 = vadd.f32 %v383_v54, %v382_v53  ;;  %v257_v22 = vadd.f32 %v256_v17, %v255_v12 }
 0x13d   :  { %248 = vst [vmem:[#allocation1 + $0x4] ss:$9 sm:$0xff] %v704_v38  ;;  %v393_v53 = vmul.f32 %v617_v26, %v392_v48 }
 0x13e   :  { %249 = vst [vmem:[#allocation1 + $0x5] ss:$9 sm:$0xff] %v707_v39  ;;  %386 = vrot.lane.b32.xlu1 %v384_v55, %s621_s1  ;;  %v258_v27 = vrot.slane %v257_v22, 2 }
 0x13f   :  { %250 = vst [vmem:[#allocation1 + $0x6] ss:$9 sm:$0xff] %v721_v56 }
 0x140   :  { %v259_v45 = vadd.f32 %v258_v27, %v257_v22  ;;  %v402_v22 = vld [vmem:[%s872_s2] sm:$0x1] }
 0x142   :  { %v260_v50 = vrot.slane %v259_v45, 1 }
 0x144   :  { %v261_v55 = vadd.f32 %v260_v50, %v259_v45 }
 0x146   :  { %v251_v59 = vld [vmem:[#allocation1] sm:$0xff] }
 0x147   :  { %325 = vst [vmem:[#allocation1] ss:$9 sm:$0xff] %v297_v57  ;;  %v262_v11 = vsel %vm254_vm9, %v251_v59, 0.0  ;;  %v394_v59 = vadd.f32 %v617_v26, %v393_v53 }
 0x148   :  { %327 = vst [vmem:[#allocation1 + $0x1] ss:$9 sm:$0xff] %v298_v58  ;;  %v263_v15 = vrot.slane %v262_v11, 4 }
 0x149   :  { %329 = vst [vmem:[#allocation1 + $0x2] ss:$9 sm:$0xff] %v299_v60 }
 0x14a   :  { %331 = vst [vmem:[#allocation1 + $0x3] ss:$9 sm:$0xff] %v300_v61  ;;  %v264_v20 = vadd.f32 %v263_v15, %v262_v11  ;;  %v270_v61 = vsel %vm269_vm10, %v261_v55, 0.0 }
 0x14b   :  { %333 = vst [vmem:[#allocation1 + $0x4] ss:$9 sm:$0xff] %v301_v62 }
 0x14c   :  { %335 = vst [vmem:[#allocation1 + $0x5] ss:$9 sm:$0xff] %v302_v0  ;;  %v265_v24 = vrot.slane %v264_v20, 2 }
 0x14d   :  { %337 = vst [vmem:[#allocation1 + $0x6] ss:$9 sm:$0xff] %v303_v1  ;;  %v396_v1 = vsel %vm395_vm11, %v617_v26, %v394_v59 }
 0x14e   :  { %v266_v41 = vadd.f32 %v265_v24, %v264_v20 }
 0x150   :  { %v267_v47 = vrot.slane %v266_v41, 1 }
 0x152   :  { %v268_v52 = vadd.f32 %v267_v47, %v266_v41  ;;  %v419_v47 = vld [vmem:[%s873_s3] sm:$0x1] }
 0x154   :  { %v338_v4 = vld [vmem:[#allocation1] sm:$0xff]  ;;  %v271_v58 = vsel %vm269_vm10, %v268_v52, 0.0 }
 0x155   :  { %343 = vst [vmem:[#allocation1 + $0x4] ss:$9 sm:$0xff] %v308_v2  ;;  %v349_v16 = vsel %vm254_vm9, %v338_v4, 0.0  ;;  %v272_v0 = vadd.f32 %v271_v58, %v270_v61 }
 0x156   :  { %339 = vst [vmem:[#allocation1] ss:$9 sm:$0xff] %v304_v3  ;;  %v350_v21 = vrot.slane %v349_v16, 4 }
 0x157   :  { %340 = vst [vmem:[#allocation1 + $0x1] ss:$9 sm:$0xff] %v305_v5 }
 0x158   :  { %341 = vst [vmem:[#allocation1 + $0x2] ss:$9 sm:$0xff] %v306_v6  ;;  %v351_v25 = vadd.f32 %v350_v21, %v349_v16 }
 0x159   :  { %342 = vst [vmem:[#allocation1 + $0x3] ss:$9 sm:$0xff] %v307_v7 }
 0x15a   :  { %344 = vst [vmem:[#allocation1 + $0x5] ss:$9 sm:$0xff] %v309_v8  ;;  %v352_v44 = vrot.slane %v351_v25, 2 }
 0x15b   :  { %345 = vst [vmem:[#allocation1 + $0x6] ss:$9 sm:$0xff] %v310_v9 }
 0x15c   :  { %v353_v49 = vadd.f32 %v352_v44, %v351_v25 }
 0x15e   :  { %v354_v54 = vrot.slane %v353_v49, 1 }
 0x160   :  { %v355_v60 = vadd.f32 %v354_v54, %v353_v49 }
 0x162   :  { %v346_v10 = vld [vmem:[#allocation1] sm:$0xff]  ;;  %v363_v3 = vsel %vm269_vm10, %v355_v60, 0.0 }
 0x163   :  { %v356_v14 = vsel %vm254_vm9, %v346_v10, 0.0 }
 0x164   :  { %v357_v18 = vrot.slane %v356_v14, 4 }
 0x166   :  { %v358_v23 = vadd.f32 %v357_v18, %v356_v14 }
 0x168   :  { %v359_v40 = vrot.slane %v358_v23, 2 }
 0x16a   :  { %v360_v46 = vadd.f32 %v359_v40, %v358_v23 }
 0x16c   :  { %v361_v51 = vrot.slane %v360_v46, 1 }
 0x16e   :  { %v362_v57 = vadd.f32 %v361_v51, %v360_v46 }
 0x170   :  { %v364_v62 = vsel %vm269_vm10, %v362_v57, 0.0 }
 0x171   :  { %v365_v5 = vadd.f32 %v364_v62, %v363_v3 }
 0x1ae   :  { %v294_v2 = vpop.permute.xlu0 %293 }
 0x1af   :  { %v296_v4 = vadd.f32 %v294_v2, %v272_v0 }
 0x1b0   :  { %v387_v6 = vpop.permute.xlu1 %386 }
 0x1b1   :  { %v397_v7 = vmul.f32 %v396_v1, %v296_v4  ;;  %v389_v8 = vadd.f32 %v387_v6, %v365_v5 }
 0x1b3   :  { %v399_v9 = vmul.f32 %v397_v7, %v397_v7  ;;  %v398_v10 = vmul.f32 %v396_v1, %v389_v8 }
 0x1b5   :  { %v400_v11 = vsub.f32 %v398_v10, %v399_v9 }
 0x1b7   :  { %v401_v12 = vmax.f32 %v400_v11, 0.0 }
 0x1b9   :  { %v403_v14 = vadd.f32 1e-05, %v401_v12 }
 0x1bb   :  { %618 = vrsqrt.f32 %v403_v14  ;;  %vm410_vm13 = vweird.f32 %v403_v14 }
 0x1c1   :  { %v619_v15 = vpop.eup %618 }
 0x1c2   :  { %v405_v16 = vmul.f32 %v619_v15, %v403_v14  ;;  %vm411_vm12 = vweird.f32 %v619_v15 }
 0x1c3   :  { %vm412_vm14 = vmor %vm410_vm13, %vm411_vm12 }
 0x1c4   :  { %v406_v17 = vmul.f32 %v619_v15, %v405_v16 }
 0x1c6   :  { %v407_v18 = vmul.f32 0.5, %v406_v17 }
 0x1c8   :  { %v408_v19 = vsub.f32 1.5, %v407_v18 }
 0x1ca   :  { %v409_v20 = vmul.f32 %v619_v15, %v408_v19 }
 0x1cc   :  { %v413_v21 = vsel %vm412_vm14, %v619_v15, %v409_v20 }
 0x1cd   :  { %415 = vrot.lane.b32.xlu2 %v413_v21, %s623_s24 }
 0x227   :  { %v416_v23 = vpop.permute.xlu2 %415 }
 0x228   :  { %v418_v24 = vmul.f32 %v416_v23, %v402_v22 }
 0x22a   :  { %v421_v25 = vperm.slane %v418_v24, 0 }
 0x22c   :  { %422 = vrot.lane.b32.xlu0 %v421_v25, %s621_s1  ;;  %v432_v26 = vrot.slane %v421_v25, 1  ;;  %v433_v27 = vrot.slane %v421_v25, 2  ;;  %v435_v40 = vrot.slane %v421_v25, 4  ;;  %v436_v41 = vrot.slane %v421_v25, 5 }
 0x22d   :  { %v434_v45 = vrot.slane %v421_v25, 3  ;;  %v437_v46 = vrot.slane %v421_v25, 6  ;;  %v585_v51 = vmul.f32 %v421_v25, %v728_v63  ;;  %v586_v52 = vmul.f32 %v421_v25, %v739_v13  ;;  %v593_v63 = vld [vmem:[%s874_s5] sm:$0xf]  ;;  %v596_v13 = vld [vmem:[%s874_s5 + $0x4] sm:$0xf] }
 0x22e   :  { %438 = vrot.lane.b32.xlu2 %v432_v26, %s621_s1 }
 0x234   :  { %440 = vrot.lane.b32.xlu0 %v433_v27, %s621_s1 }
 0x236   :  { %444 = vrot.lane.b32.xlu2 %v435_v40, %s621_s1 }
 0x23c   :  { %446 = vrot.lane.b32.xlu0 %v436_v41, %s621_s1 }
 0x288   :  { %v439_v6 = vpop.permute.xlu2 %438 }
 0x29e   :  { %v798_v43 = vpop.permute.xlu0 %422 }
 0x29f   :  { %v425_v44 = vmul.f32 %v798_v43, %v397_v7  ;;  %v445_v7 = vpop.permute.xlu2 %444  ;;  %v456_v8 = vmul.f32 %v798_v43, %v665_v28  ;;  %v457_v28 = vmul.f32 %v439_v6, %v677_v31 }
 0x2a1   :  { %427 = vrot.lane.b32.xlu1 %v425_v44, %s623_s24 }
 0x2a6   :  { %v441_v15 = vpop.permute.xlu0 %440 }
 0x2a7   :  { %v458_v25 = vmul.f32 %v441_v15, %v672_v30  ;;  %v463_v30 = vmul.f32 %v798_v43, %v691_v35 }
 0x2a9   :  { %442 = vrot.lane.b32.xlu1 %v434_v45, %s621_s1  ;;  %v460_v45 = vmul.f32 %v445_v7, %v669_v29 }
 0x2ae   :  { %v447_v23 = vpop.permute.xlu0 %446 }
 0x2b1   :  { %448 = vrot.lane.b32.xlu1 %v437_v46, %s621_s1 }
 0x313   :  { %v428_v48 = vpop.permute.xlu1 %427 }
 0x314   :  { %v430_v49 = vsub.f32 %v419_v47, %v428_v48 }
 0x316   :  { %v471_v50 = vperm.slane %v430_v49, 0 }
 0x318   :  { %479 = vrot.lane.b32.xlu2 %v471_v50, %s621_s1  ;;  %v474_v53 = vrot.slane %v471_v50, 2  ;;  %v473_v54 = vrot.slane %v471_v50, 1  ;;  %v587_v55 = vadd.f32 %v585_v51, %v471_v50  ;;  %v588_v57 = vadd.f32 %v586_v52, %v471_v50 }
 0x319   :  { %v475_v0 = vrot.slane %v471_v50, 3  ;;  %v477_v3 = vrot.slane %v471_v50, 5  ;;  %v476_v4 = vrot.slane %v471_v50, 4  ;;  %v478_v5 = vrot.slane %v471_v50, 6 }
 0x31a   :  { %483 = vrot.lane.b32.xlu1 %v474_v53, %s621_s1  ;;  %481 = vrot.lane.b32.xlu0 %v473_v54, %s621_s1  ;;  %v589_v58 = vmax.f32 %v587_v55, 0.0  ;;  %v590_v59 = vmax.f32 %v588_v57, 0.0  ;;  %v464_v51 = vmul.f32 %v439_v6, %v688_v34  ;;  %v465_v52 = vmul.f32 %v441_v15, %v695_v36 }
 0x31b   :  { %v443_v11 = vpop.permute.xlu1 %442  ;;  %v468_v57 = vmul.f32 %v447_v23, %v707_v39 }
 0x31c   :  { %v591_v61 = vpack.c.bf16 %v589_v58, %v589_v58  ;;  %v592_v62 = vpack.c.bf16 %v590_v59, %v590_v59  ;;  %v459_v14 = vmul.f32 %v443_v11, %v684_v33  ;;  %v466_v29 = vmul.f32 %v443_v11, %v700_v37 }
 0x31e   :  { %v594_v1 = vsel %vm812_vm1, %v591_v61, %v593_v63  ;;  %v597_v2 = vsel %vm812_vm1, %v592_v62, %v596_v13 }
 0x31f   :  { %595 = vst [vmem:[%s874_s5] sm:$0xf] %v594_v1 }
 0x320   :  { %485 = vrot.lane.b32.xlu2 %v475_v0, %s621_s1  ;;  %598 = vst [vmem:[%s874_s5 + $0x4] sm:$0xf] %v597_v2  ;;  %v579_v2 = vld [vmem:[%s875_s4] sm:$0xf] }
 0x322   :  { %489 = vrot.lane.b32.xlu1 %v477_v3, %s621_s1  ;;  %487 = vrot.lane.b32.xlu0 %v476_v4, %s621_s1 }
 0x323   :  { %v449_v19 = vpop.permute.xlu1 %448 }
 0x324   :  { %v462_v20 = vmul.f32 %v449_v19, %v713_v42  ;;  %v461_v42 = vmul.f32 %v447_v23, %v681_v32  ;;  %v467_v32 = vmul.f32 %v445_v7, %v704_v38  ;;  %v469_v59 = vmul.f32 %v449_v19, %v721_v56 }
 0x328   :  { %491 = vrot.lane.b32.xlu2 %v478_v5, %s621_s1  ;;  %v582_v5 = vld [vmem:[%s875_s4 + $0x4] sm:$0xf] }
 0x372   :  { %v480_v9 = vpop.permute.xlu2 %479 }
 0x373   :  { %v500_v10 = vadd.f32 %v480_v9, %v456_v8  ;;  %v507_v53 = vadd.f32 %v480_v9, %v463_v30 }
 0x375   :  { %v514_v12 = vmax.f32 %v500_v10, 0.0  ;;  %v521_v63 = vmax.f32 %v507_v53, 0.0 }
 0x377   :  { %542 = vst [vmem:[#allocation1] ss:$9 sm:$0xff] %v514_v12 }
 0x37a   :  { %v486_v16 = vpop.permute.xlu2 %485 }
 0x37b   :  { %v503_v17 = vadd.f32 %v486_v16, %v459_v14  ;;  %v510_v58 = vadd.f32 %v486_v16, %v466_v29 }
 0x37d   :  { %v517_v18 = vmax.f32 %v503_v17, 0.0  ;;  %v524_v0 = vmax.f32 %v510_v58, 0.0 }
 0x37f   :  { %548 = vst [vmem:[#allocation1 + $0x3] ss:$9 sm:$0xff] %v517_v18 }
 0x382   :  { %v492_v21 = vpop.permute.xlu2 %491 }
 0x383   :  { %v506_v22 = vadd.f32 %v492_v21, %v462_v20  ;;  %v513_v34 = vadd.f32 %v492_v21, %v469_v59 }
 0x385   :  { %v520_v24 = vmax.f32 %v506_v22, 0.0  ;;  %v527_v39 = vmax.f32 %v513_v34, 0.0 }
 0x387   :  { %554 = vst [vmem:[#allocation1 + $0x6] ss:$9 sm:$0xff] %v520_v24 }
 0x38c   :  { %v484_v26 = vpop.permute.xlu1 %483  ;;  %v482_v27 = vpop.permute.xlu0 %481 }
 0x38d   :  { %v502_v33 = vadd.f32 %v484_v26, %v458_v25  ;;  %v501_v40 = vadd.f32 %v482_v27, %v457_v28  ;;  %v508_v54 = vadd.f32 %v482_v27, %v464_v51  ;;  %v509_v55 = vadd.f32 %v484_v26, %v465_v52 }
 0x38f   :  { %v516_v41 = vmax.f32 %v502_v33, 0.0  ;;  %v515_v44 = vmax.f32 %v501_v40, 0.0  ;;  %v522_v35 = vmax.f32 %v508_v54, 0.0  ;;  %v523_v62 = vmax.f32 %v509_v55, 0.0 }
 0x391   :  { %546 = vst [vmem:[#allocation1 + $0x2] ss:$9 sm:$0xff] %v516_v41 }
 0x392   :  { %544 = vst [vmem:[#allocation1 + $0x1] ss:$9 sm:$0xff] %v515_v44 }
 0x394   :  { %v490_v46 = vpop.permute.xlu1 %489  ;;  %v488_v47 = vpop.permute.xlu0 %487 }
 0x395   :  { %v505_v48 = vadd.f32 %v490_v46, %v461_v42  ;;  %v504_v49 = vadd.f32 %v488_v47, %v460_v45  ;;  %v511_v13 = vadd.f32 %v488_v47, %v467_v32  ;;  %v512_v43 = vadd.f32 %v490_v46, %v468_v57 }
 0x397   :  { %v519_v50 = vmax.f32 %v505_v48, 0.0  ;;  %v518_v31 = vmax.f32 %v504_v49, 0.0  ;;  %v525_v37 = vmax.f32 %v511_v13, 0.0  ;;  %v526_v38 = vmax.f32 %v512_v43, 0.0 }
 0x399   :  { %552 = vst [vmem:[#allocation1 + $0x5] ss:$9 sm:$0xff] %v519_v50 }
 0x39a   :  { %550 = vst [vmem:[#allocation1 + $0x4] ss:$9 sm:$0xff] %v518_v31 }
 0x3a1   :  { %v555_v61 = vld [vmem:[#allocation1] sm:$0xff] }
 0x3a2   :  { %v566_v36 = vpack.c.bf16 %v555_v61, %v555_v61  ;;  %556 = vst [vmem:[#allocation1] ss:$9 sm:$0xff] %v521_v63 }
 0x3a3   :  { %557 = vst [vmem:[#allocation1 + $0x1] ss:$9 sm:$0xff] %v522_v35 }
 0x3a4   :  { %570 = vrot.lane.b32.xlu0 %v566_v36, %s623_s24  ;;  %558 = vst [vmem:[#allocation1 + $0x2] ss:$9 sm:$0xff] %v523_v62 }
 0x3a5   :  { %559 = vst [vmem:[#allocation1 + $0x3] ss:$9 sm:$0xff] %v524_v0 }
 0x3a6   :  { %560 = vst [vmem:[#allocation1 + $0x4] ss:$9 sm:$0xff] %v525_v37 }
 0x3a7   :  { %561 = vst [vmem:[#allocation1 + $0x5] ss:$9 sm:$0xff] %v526_v38 }
 0x3a8   :  { %562 = vst [vmem:[#allocation1 + $0x6] ss:$9 sm:$0xff] %v527_v39 }
 0x3af   :  { %v563_v56 = vld [vmem:[#allocation1] sm:$0xff] }
 0x3b0   :  { %v567_v1 = vpack.c.bf16 %v563_v56, %v563_v56 }
 0x3b2   :  { %572 = vrot.lane.b32.xlu1 %v567_v1, %s623_s24 }
 0x416   :  { %v571_v3 = vpop.permute.xlu0 %570 }
 0x417   :  { %v580_v4 = vsel %vm812_vm1, %v571_v3, %v579_v2 }
 0x418   :  { %581 = vst [vmem:[%s875_s4] sm:$0xf] %v580_v4 }
 0x424   :  { %v573_v6 = vpop.permute.xlu1 %572 }
 0x425   :  { %v583_v7 = vsel %vm812_vm1, %v573_v6, %v582_v5 }
 0x426   :  { %584 = vst [vmem:[%s875_s4 + $0x4] sm:$0xf] %v583_v7 }

// kernel: fcn_n_forward.9
= control target key start
LH: loop header
LB: loop body
LE: loop exit
PB: predicated region body
PF: predicated region fallthrough
CT: control target
= control target key end

     0   :  { %s382_s9 = smov 0   ;;  %s384_s10 = smov 0   ;;  %s421_s0 = inlined_call_operand.vmem [shape: f32[16,13], index: 0, kind: input, shape index: {}]   ;;  %s422_s1 = inlined_call_operand.vmem [shape: bf16[2,13,4], index: 1, kind: input, shape index: {}]   ;;  %s423_s2 = inlined_call_operand.vmem [shape: f32[2,16,4], index: 2, kind: output, shape index: {}]  }
   0x1   :  { %s386_s11 = smov 0  }
   0x2 LB: > { %s24_s12 = sadd.s32 1, %s361_s10  ;;  %p305_p0 = scmp.ge.s32.totalorder %s365_s11, 1  ;;  %s365_s11 = sphi %s386_s11, %s12_s11   ;;  %s361_s10 = sphi %s384_s10, %s425_s10   ;;  %s357_s9 = sphi %s382_s9, %s424_s9  }
   0x3   : > { %p26_p1 = scmp.ge.s32.totalorder %s24_s12, 2  ;;  %p131_p2 = scmp.lt.s32.totalorder %s365_s11, 3 }
   0x5   : > { %s427_s12 = smov (%p26_p1, %s24_s12), 0  ;;  %p132_p3 = pnand %p305_p0, %p131_p2 }
   0x6   : > { %p159_p4 = scmp.lt.s32.totalorder (!%p132_p3), %s357_s9, 1 }
   0x7   : > { %135 = sbr.rel (%p132_p3) target bundleno = 149 (0x95), region = 28 }
   0xc   : > { %s429_s9 = smov (!%p159_p4, %s357_s9), 1  ;;  %vm188_vm0 = vcmask 1044480   ;;  %v179_v4 = vld [vmem:[%s421_s0] sm:$0xff]  ;;  %vm181_vm1 = vcmask 105472   ;;  %v180_v5 = vld [vmem:[%s421_s0 + $0x8] sm:$0xff]  ;;  %vm215_vm2 = vcmask 31744  }
   0xd   : > { %s315_s13 = sshll.u32 %s429_s9, 3  ;;  %s316_s21 = sshll.u32 %s429_s9, 4 }
   0xe   : > { %s166_s16 = scalar_lea.vmem %s422_s1, %s315_s13  ;;  %s174_s24 = scalar_lea.vmem %s423_s2, %s316_s21 }
   0xf   : > { %v176_v0 = vld [vmem:[%s166_s16 + $0x4] sm:$0x7]  ;;  %v175_v1 = vld [vmem:[%s166_s16] sm:$0xf] }
  0x10   : > { %v178_v2 = vunpack.c.l.bf16 %v176_v0  ;;  %v177_v3 = vunpack.c.l.bf16 %v175_v1 }
  0x12   : > { %310 = vmatpush.msk.msra.mxu0 %vm188_vm0, %v178_v2  ;;  %317 = vmatpush.msk.msra.mxu1 %vm188_vm0, %v178_v2 }
  0x14   : > { %207 = vmatpush.msra.mxu0 %v177_v3  ;;  %318 = vmatpush.msra.mxu1 %v177_v3 }
  0x15   : > { %311 = vmatmul.msk.f32.vlgmr.msra.gmra.mxu0 %vm181_vm1, %v179_v4  ;;  %312 = vmatmul.msk.f32.vlgmr.msra.gmra.mxu1 %vm181_vm1, %v180_v5 }
  0x92   : > { %v209_v6 = vpop.f32.mrf.mxu0  ;;  %v212_v7 = vpop.f32.mrf.mxu1 }
  0x93   : > { %216 = vst.msk [vmem:[%s174_s24] sm:$0xff] %vm215_vm2, %v209_v6 }
  0x94   : > { %217 = vst.msk [vmem:[%s174_s24 + $0x8] sm:$0xff] %vm215_vm2, %v212_v7 }
  0x95 PF: > { %s12_s11 = sadd.s32 1, %s365_s11   ;;  %s424_s9 = smov %s361_s10 }
  0x96   : > { %p9_p5 = scmp.ge.s32.totalorder %s12_s11, 4   ;;  %s425_s10 = smov %s427_s12 }
  0x98   :  { %11 = sbr.rel (!%p9_p5) target bundleno = 2 (0x2), region = 58 }

</bundles_post_ra>
